<compile_context>
chip_gen: v7x
topology: tpu7x:2x2x1
jax: 0.10.0
libtpu: 0.0.40
codegen_flags: <defaults>
</compile_context>

<pallas_src>
import math

import jax
import jax.numpy as jnp
from jax.experimental import pallas as pl
from jax.experimental.pallas import tpu as pltpu


MATMUL_DTYPE = jnp.float32   # set jnp.bfloat16 on v6e/v7x for native MXU rate
TILE_ROWS = 1024             # candidate-row tile for the target kernel
MOTION_ROWS = 256            # target MXU row depth per motion grid step
HIGHEST = jax.lax.Precision.HIGHEST


def _round_up(x, m):
    return ((x + m - 1) // m) * m


# ----------------------------------------------------------------------------
# In-kernel helpers
# ----------------------------------------------------------------------------
def _layernorm(h, g, b, eps=1e-5):
    # One-pass stats: the two cross-lane reduces (h and h*h) are independent.
    mu = jnp.mean(h, axis=-1, keepdims=True)
    var = jnp.mean(h * h, axis=-1, keepdims=True) - mu * mu
    return (h - mu) * jax.lax.rsqrt(var + eps) * g + b


def _ln_relu_l2(h, w, H):
    """LN1 -> ReLU -> Linear2 -> LN2 -> ReLU on a 2-D layer-1 pre-activation.

    w: (H+8, H) packed slab: rows 0-1 w1c, 2 g1, 3 be1, 4 b2, 5 g2, 6 be2,
       7 pad, 8.. w2.
    """
    g1, be1 = w[2:3], w[3:4]
    b2, g2, be2 = w[4:5], w[5:6], w[6:7]
    w2 = w[8:8 + H]
    h = jnp.maximum(_layernorm(h, g1, be1), 0.0)
    h = jnp.dot(h.astype(MATMUL_DTYPE), w2.astype(MATMUL_DTYPE),
                preferred_element_type=jnp.float32) + b2
    return jnp.maximum(_layernorm(h, g2, be2), 0.0)


# ----------------------------------------------------------------------------
# Kernel 1: fused TargetPred (prob_mlp + offset_mlp, one lane-dense output)
# ----------------------------------------------------------------------------
def _target_kernel(cand_ref, fb_ref, wsl_ref, w3b_ref, out_ref):
    ph = wsl_ref.shape[0] // 2     # rows per path slab (= H + 8)
    H = wsl_ref.shape[1]
    c = cand_ref[0]                # (tile_n, 2)   candidate (x, y)
    fb = fb_ref[0]                 # (8, H): row 0 prob fbias, row 1 offset fbias
    wsl = wsl_ref[...]             # (2*(H+8), H)
    w3b = w3b_ref[...]             # (2H+8, OP): rows 0..2H-1 stacked W3, row 2H b3

    wp, wo = wsl[0:ph], wsl[ph:2 * ph]
    # Layer 1: K=2 contraction as VPU broadcast FMAs + hoisted feature bias.
    h1p = c[:, 0:1] * wp[0:1] + c[:, 1:2] * wp[1:2] + fb[0:1]
    h1o = c[:, 0:1] * wo[0:1] + c[:, 1:2] * wo[1:2] + fb[1:2]
    h2p = _ln_relu_l2(h1p, wp, H)
    h2o = _ln_relu_l2(h1o, wo, H)
    # Fused final projection: one K=2H matmul onto the padded output slab
    # (prob W3 occupies column 0, offset W3 columns 1:3; other lanes zero).
    h2 = jnp.concatenate([h2p, h2o], axis=-1)              # (tile_n, 2H)
    y = jnp.dot(h2.astype(MATMUL_DTYPE), w3b[0:2 * H].astype(MATMUL_DTYPE),
                preferred_element_type=jnp.float32) + w3b[2 * H:2 * H + 1]
    out_ref[0] = y.astype(out_ref.dtype)


# ----------------------------------------------------------------------------
# Kernel 2: MotionEstimation (traj_pred MLP, batch-folded, padded output)
# ----------------------------------------------------------------------------
def _traj_kernel(loc_ref, fb_ref, wsl_ref, w3b_ref, out_ref):
    H = wsl_ref.shape[1]
    bblk, m, _ = loc_ref.shape
    c = loc_ref[...]                              # (bblk, m, 2)
    fb = fb_ref[...][:, 0:1, :]                   # (bblk, 1, H) per-batch fbias
    w = wsl_ref[...]                              # (H+8, H)
    w3b = w3b_ref[...]                            # (H+8, OP): rows 0..H-1 W3, row H b3

    h1 = c[..., 0:1] * w[0:1] + c[..., 1:2] * w[1:2] + fb   # (bblk, m, H)
    h2 = _ln_relu_l2(h1.reshape(bblk * m, H), w, H)
    y = jnp.dot(h2.astype(MATMUL_DTYPE), w3b[0:H].astype(MATMUL_DTYPE),
                preferred_element_type=jnp.float32) + w3b[H:H + 1]
    out_ref[...] = y.reshape(bblk, m, -1).astype(out_ref.dtype)


# ----------------------------------------------------------------------------
# pallas_call wrappers
# ----------------------------------------------------------------------------
def target_pred_pallas(feat3, cand, tp):
    """feat3 (B,1,C), cand (B,N,2) -> (B, N, OUT_PAD):
       col 0 = prob logit, cols 1:3 = offset, remaining lanes zero."""
    B, _, C = feat3.shape
    N = cand.shape[1]
    H = tp["wsl"].shape[1]
    OP = tp["w3b"].shape[1]

    # Hoisted per-batch layer-1 feature contribution (one tiny matmul/path).
    f = feat3[:, 0, :]
    fb = jnp.zeros((B, 8, H), jnp.float32)
    fb = fb.at[:, 0, :].set(jnp.dot(f, tp["w1f_p"], precision=HIGHEST) + tp["b1_p"])
    fb = fb.at[:, 1, :].set(jnp.dot(f, tp["w1f_o"], precision=HIGHEST) + tp["b1_o"])

    tile_n = min(TILE_ROWS, _round_up(N, 8))
    grid = (B, pl.cdiv(N, tile_n))

    flops = B * N * (4 * H * H + 4 * H * OP + 16 * H)
    bytes_accessed = 4 * (cand.size + B * N * OP + fb.size
                          + tp["wsl"].size + tp["w3b"].size)

    return pl.pallas_call(
        _target_kernel,
        out_shape=jax.ShapeDtypeStruct((B, N, OP), jnp.float32),
        grid=grid,
        in_specs=[
            pl.BlockSpec((1, tile_n, 2), lambda b, i: (b, i, 0)),
            pl.BlockSpec((1, 8, H), lambda b, i: (b, 0, 0)),
            pl.BlockSpec(tp["wsl"].shape, lambda b, i: (0, 0)),
            pl.BlockSpec(tp["w3b"].shape, lambda b, i: (0, 0)),
        ],
        out_specs=pl.BlockSpec((1, tile_n, OP), lambda b, i: (b, i, 0)),
        compiler_params=pltpu.CompilerParams(
            dimension_semantics=("parallel", "parallel")),
        cost_estimate=pl.CostEstimate(flops=flops, transcendentals=0,
                                      bytes_accessed=bytes_accessed),
    )(cand, fb, tp["wsl"], tp["w3b"])


def motion_pallas(feat3, loc, mp):
    """feat3 (B,1,C), loc (B,M,2) -> (B, M, OUT_PAD) padded trajectory."""
    B, _, C = feat3.shape
    M = loc.shape[1]
    H = mp["wsl"].shape[1]
    OP = mp["w3b"].shape[1]

    f = feat3[:, 0, :]
    fb = jnp.zeros((B, 8, H), jnp.float32)
    fb = fb.at[:, 0, :].set(jnp.dot(f, mp["w1f"], precision=HIGHEST) + mp["b1"])

    # Fold batches so each grid step feeds the MXU ~MOTION_ROWS rows, but keep
    # >= 2 grid steps (when B >= 2) so both v7x TensorCores get work.
    bblk = max(1, min(B, MOTION_ROWS // max(M, 1)))
    if B >= 2:
        bblk = min(bblk, (B + 1) // 2)
    grid = (pl.cdiv(B, bblk),)

    flops = B * M * (2 * H * H + 2 * H * OP + 8 * H)
    bytes_accessed = 4 * (loc.size + B * M * OP + fb.size
                          + mp["wsl"].size + mp["w3b"].size)

    return pl.pallas_call(
        _traj_kernel,
        out_shape=jax.ShapeDtypeStruct((B, M, OP), jnp.float32),
        grid=grid,
        in_specs=[
            pl.BlockSpec((bblk, M, 2), lambda g: (g, 0, 0)),
            pl.BlockSpec((bblk, 8, H), lambda g: (g, 0, 0)),
            pl.BlockSpec(mp["wsl"].shape, lambda g: (0, 0)),
            pl.BlockSpec(mp["w3b"].shape, lambda g: (0, 0)),
        ],
        out_specs=pl.BlockSpec((bblk, M, OP), lambda g: (g, 0, 0)),
        compiler_params=pltpu.CompilerParams(
            dimension_semantics=("parallel",)),
        cost_estimate=pl.CostEstimate(flops=flops, transcendentals=0,
                                      bytes_accessed=bytes_accessed),
    )(loc, fb, mp["wsl"], mp["w3b"])


# ----------------------------------------------------------------------------
# Deterministic parameter init (matches nn.Linear default uniform init,
# LayerNorm gamma=1, beta=0) + kernel-ready packing.
# ----------------------------------------------------------------------------
def _init_linear(key, fan_in, fan_out):
    k1, k2 = jax.random.split(key)
    bound = 1.0 / math.sqrt(fan_in)
    w = jax.random.uniform(k1, (fan_in, fan_out), jnp.float32, -bound, bound)
    b = jax.random.uniform(k2, (fan_out,), jnp.float32, -bound, bound)
    return w, b


def _init_mlp3_raw(key, c, hidden, d_out):
    k1, k2, k3 = jax.random.split(key, 3)
    w1, b1 = _init_linear(k1, c + 2, hidden)
    w2, b2 = _init_linear(k2, hidden, hidden)
    w3, b3 = _init_linear(k3, hidden, d_out)
    one = jnp.ones((hidden,), jnp.float32)
    zero = jnp.zeros((hidden,), jnp.float32)
    return dict(w1f=w1[:c], w1c=w1[c:], b1=b1, g1=one, be1=zero,
                w2=w2, b2=b2, g2=one, be2=zero, w3=w3, b3=b3)


def _pack_small(r, H):
    """(H+8, H) slab: rows 0-1 w1c, 2 g1, 3 be1, 4 b2, 5 g2, 6 be2, 7 pad, 8.. w2."""
    wsl = jnp.zeros((H + 8, H), jnp.float32)
    wsl = wsl.at[0:2].set(r["w1c"])
    wsl = wsl.at[2].set(r["g1"]).at[3].set(r["be1"])
    wsl = wsl.at[4].set(r["b2"]).at[5].set(r["g2"]).at[6].set(r["be2"])
    return wsl.at[8:8 + H].set(r["w2"])


def init_tnt_decoder(key, in_channels, hidden_dim=64, horizon=30):
    assert hidden_dim % 8 == 0, "hidden_dim must be a multiple of 8"
    H = hidden_dim
    kp, ko, km = jax.random.split(key, 3)
    rp = _init_mlp3_raw(kp, in_channels, H, 1)           # prob_mlp
    ro = _init_mlp3_raw(ko, in_channels, H, 2)           # offset_mlp
    rt = _init_mlp3_raw(km, in_channels, H, horizon * 2)  # traj_pred

    # Target: fused prob+offset.  W3s row-stacked and column-padded so one
    # K=2H matmul writes [prob | offset | 0-pad]; b3 lives in the last slab row.
    op_t = 128
    w3b_t = jnp.zeros((2 * H + 8, op_t), jnp.float32)
    w3b_t = w3b_t.at[0:H, 0:1].set(rp["w3"])
    w3b_t = w3b_t.at[H:2 * H, 1:3].set(ro["w3"])
    w3b_t = w3b_t.at[2 * H, 0:1].set(rp["b3"]).at[2 * H, 1:3].set(ro["b3"])
    target = dict(w1f_p=rp["w1f"], b1_p=rp["b1"],
                  w1f_o=ro["w1f"], b1_o=ro["b1"],
                  wsl=jnp.concatenate([_pack_small(rp, H), _pack_small(ro, H)], 0),
                  w3b=w3b_t)

    op_m = max(128, _round_up(horizon * 2, 128))
    w3b_m = jnp.zeros((H + 8, op_m), jnp.float32)
    w3b_m = w3b_m.at[0:H, 0:horizon * 2].set(rt["w3"])
    w3b_m = w3b_m.at[H, 0:horizon * 2].set(rt["b3"])
    traj = dict(w1f=rt["w1f"], b1=rt["b1"], wsl=_pack_small(rt, H), w3b=w3b_m)

    return dict(target=target, traj=traj,
                raw=dict(prob=rp, offset=ro, traj=rt))


# ----------------------------------------------------------------------------
# TNTDecoder inference forward (is_train=False path).
# ----------------------------------------------------------------------------
def tnt_decoder_inference(params, feat_in, tar_candidate, mask, M, horizon):
    """
    feat_in:       (B, 1, C)    encoded trajectory feature
    tar_candidate: (B, N, 2)    candidate target positions
    mask:          (B, N, 1)    additive mask on the prob logits
    returns (pred_traj (B, M, horizon*2), prob_selected (B, M, 1))
    """
    # ---- TargetPred: fused prob + offset MLPs in one kernel ----------------
    out = target_pred_pallas(feat_in, tar_candidate, params["target"])
    prob_logits = out[..., 0:1] + mask                               # (B, N, 1)
    tar_offset = out[..., 1:3]                                       # (B, N, 2)
    tar_prob = jax.nn.softmax(prob_logits, axis=1)

    # top-k over candidates, then gather (plain-JAX selection glue).
    prob_vals, idx = jax.lax.top_k(tar_prob[..., 0], M)              # (B, M)
    prob_selected = prob_vals[..., None]                             # (B, M, 1)
    idx2 = idx[..., None]                                            # (B, M, 1)
    tar_selected = (jnp.take_along_axis(tar_candidate, idx2, axis=1)
                    + jnp.take_along_axis(tar_offset, idx2, axis=1))  # (B, M, 2)

    # ---- MotionEstimation ---------------------------------------------------
    traj = motion_pallas(feat_in, tar_selected, params["traj"])
    pred_traj = traj[..., :horizon * 2]                              # (B, M, H*2)
    return pred_traj, prob_selected


# ----------------------------------------------------------------------------
# Pure-JAX reference (for correctness checking only)
# ----------------------------------------------------------------------------
def _mlp3_ref(x, r):
    w1 = jnp.concatenate([r["w1f"], r["w1c"]], axis=0)
    h = jnp.dot(x, w1, precision=HIGHEST) + r["b1"]
    h = jnp.maximum(_layernorm(h, r["g1"], r["be1"]), 0.0)
    h = jnp.dot(h, r["w2"], precision=HIGHEST) + r["b2"]
    h = jnp.maximum(_layernorm(h, r["g2"], r["be2"]), 0.0)
    return jnp.dot(h, r["w3"], precision=HIGHEST) + r["b3"]


# ----------------------------------------------------------------------------
if __name__ == "__main__":
    B = 2            # batch
    C = 16           # in_channels
    HIDDEN = 32      # hidden_dim
    N = 64           # number of target candidates
    M = 8            # top-M candidates
    HORIZON = 4      # prediction horizon

    key = jax.random.PRNGKey(0)
    kp, kf, kc, kmask = jax.random.split(key, 4)

    params = init_tnt_decoder(kp, C, hidden_dim=HIDDEN, horizon=HORIZON)

    feat_in = jax.random.normal(kf, (B, 1, C), jnp.float32)
    tar_candidate = jax.random.normal(kc, (B, N, 2), jnp.float32) * 5.0
    mask_bits = jax.random.bernoulli(kmask, 0.25, (B, N, 1))
    mask = jnp.where(mask_bits, -1e9, 0.0).astype(jnp.float32)

    pred_traj, prob_selected = tnt_decoder_inference(
        params, feat_in, tar_candidate, mask, M, HORIZON)
    jax.block_until_ready((pred_traj, prob_selected))

    assert pred_traj.shape == (B, M, HORIZON * 2)
    assert prob_selected.shape == (B, M, 1)
    assert bool(jnp.all(jnp.isfinite(pred_traj)))
    assert bool(jnp.all(prob_selected >= 0.0))

    # --- numeric check of the Pallas kernels vs. a pure-JAX reference -------
    feat_n = jnp.broadcast_to(feat_in, (B, N, C))
    xcat = jnp.concatenate([feat_n, tar_candidate], axis=2).reshape(B * N, C + 2)
    out_k = target_pred_pallas(feat_in, tar_candidate, params["target"])
    prob_ref = _mlp3_ref(xcat, params["raw"]["prob"]).reshape(B, N, 1)
    off_ref = _mlp3_ref(xcat, params["raw"]["offset"]).reshape(B, N, 2)
    assert bool(jnp.allclose(out_k[..., 0:1], prob_ref, atol=1e-3, rtol=1e-3))
    assert bool(jnp.allclose(out_k[..., 1:3], off_ref, atol=1e-3, rtol=1e-3))

    loc = tar_candidate[:, :M, :]
    traj_k = motion_pallas(feat_in, loc, params["traj"])[..., :HORIZON * 2]
    feat_m = jnp.broadcast_to(feat_in, (B, M, C))
    xm = jnp.concatenate([feat_m, loc], axis=2).reshape(B * M, C + 2)
    traj_ref = _mlp3_ref(xm, params["raw"]["traj"]).reshape(B, M, -1)
    assert bool(jnp.allclose(traj_k, traj_ref, atol=1e-3, rtol=1e-3))

    print("KERNEL_OK")
</pallas_src>

<mosaic_0001>
module attributes {stable_mosaic.version = 11 : i64} {
  func.func @_target_kernel(%arg0: i32, %arg1: i32, %arg2: memref<1x64x2xf32, #tpu.memory_space<vmem>>, %arg3: memref<1x8x32xf32, #tpu.memory_space<vmem>>, %arg4: memref<80x32xf32, #tpu.memory_space<vmem>>, %arg5: memref<72x128xf32, #tpu.memory_space<vmem>>, %arg6: memref<1x64x128xf32, #tpu.memory_space<vmem>>) attributes {dimension_semantics = [#tpu.dimension_semantics<parallel>, #tpu.dimension_semantics<parallel>], iteration_bounds = array<i64: 2, 1>, scalar_prefetch = 0 : i64, scratch_operands = 0 : i64, tpu.core_type = #tpu.core_type<tc>, window_params = [{transform_indices = @transform_0, window_bounds = array<i64: 1, 64, 2>}, {transform_indices = @transform_1, window_bounds = array<i64: 1, 8, 32>}, {pipeline_mode = #tpu.pipeline_mode<synchronous>, transform_indices = @transform_2, window_bounds = array<i64: 80, 32>}, {pipeline_mode = #tpu.pipeline_mode<synchronous>, transform_indices = @transform_3, window_bounds = array<i64: 72, 128>}, {transform_indices = @transform_4, window_bounds = array<i64: 1, 64, 128>}]} {
    %c0 = arith.constant 0 : index
    %c0_0 = arith.constant 0 : index
    %c0_1 = arith.constant 0 : index
    %0 = vector.load %arg2[%c0, %c0_0, %c0_1] : memref<1x64x2xf32, #tpu.memory_space<vmem>>, vector<1x64x2xf32>
    %1 = vector.shape_cast %0 : vector<1x64x2xf32> to vector<64x2xf32>
    %c0_2 = arith.constant 0 : index
    %c0_3 = arith.constant 0 : index
    %c0_4 = arith.constant 0 : index
    %2 = vector.load %arg3[%c0_2, %c0_3, %c0_4] : memref<1x8x32xf32, #tpu.memory_space<vmem>>, vector<1x8x32xf32>
    %3 = vector.shape_cast %2 : vector<1x8x32xf32> to vector<8x32xf32>
    %c0_5 = arith.constant 0 : index
    %c0_6 = arith.constant 0 : index
    %4 = vector.load %arg4[%c0_5, %c0_6] : memref<80x32xf32, #tpu.memory_space<vmem>>, vector<80x32xf32>
    %c0_7 = arith.constant 0 : index
    %c0_8 = arith.constant 0 : index
    %5 = vector.load %arg5[%c0_7, %c0_8] : memref<72x128xf32, #tpu.memory_space<vmem>>, vector<72x128xf32>
    %6 = vector.extract_strided_slice %4 {offsets = [0, 0], sizes = [40, 32], strides = [1, 1]} : vector<80x32xf32> to vector<40x32xf32>
    %7 = vector.extract_strided_slice %4 {offsets = [40, 0], sizes = [40, 32], strides = [1, 1]} : vector<80x32xf32> to vector<40x32xf32>
    %8 = vector.extract_strided_slice %1 {offsets = [0, 0], sizes = [64, 1], strides = [1, 1]} : vector<64x2xf32> to vector<64x1xf32>
    %9 = vector.extract_strided_slice %6 {offsets = [0, 0], sizes = [1, 32], strides = [1, 1]} : vector<40x32xf32> to vector<1x32xf32>
    %10 = vector.broadcast %8 : vector<64x1xf32> to vector<64x32xf32>
    %11 = vector.broadcast %9 : vector<1x32xf32> to vector<64x32xf32>
    %12 = arith.mulf %10, %11 : vector<64x32xf32>
    %13 = vector.extract_strided_slice %1 {offsets = [0, 1], sizes = [64, 1], strides = [1, 1]} : vector<64x2xf32> to vector<64x1xf32>
    %14 = vector.extract_strided_slice %6 {offsets = [1, 0], sizes = [1, 32], strides = [1, 1]} : vector<40x32xf32> to vector<1x32xf32>
    %15 = vector.broadcast %13 : vector<64x1xf32> to vector<64x32xf32>
    %16 = vector.broadcast %14 : vector<1x32xf32> to vector<64x32xf32>
    %17 = arith.mulf %15, %16 : vector<64x32xf32>
    %18 = arith.addf %12, %17 : vector<64x32xf32>
    %19 = vector.extract_strided_slice %3 {offsets = [0, 0], sizes = [1, 32], strides = [1, 1]} : vector<8x32xf32> to vector<1x32xf32>
    %20 = vector.broadcast %19 : vector<1x32xf32> to vector<64x32xf32>
    %21 = arith.addf %18, %20 : vector<64x32xf32>
    %22 = vector.extract_strided_slice %1 {offsets = [0, 0], sizes = [64, 1], strides = [1, 1]} : vector<64x2xf32> to vector<64x1xf32>
    %23 = vector.extract_strided_slice %7 {offsets = [0, 0], sizes = [1, 32], strides = [1, 1]} : vector<40x32xf32> to vector<1x32xf32>
    %24 = vector.broadcast %22 : vector<64x1xf32> to vector<64x32xf32>
    %25 = vector.broadcast %23 : vector<1x32xf32> to vector<64x32xf32>
    %26 = arith.mulf %24, %25 : vector<64x32xf32>
    %27 = vector.extract_strided_slice %1 {offsets = [0, 1], sizes = [64, 1], strides = [1, 1]} : vector<64x2xf32> to vector<64x1xf32>
    %28 = vector.extract_strided_slice %7 {offsets = [1, 0], sizes = [1, 32], strides = [1, 1]} : vector<40x32xf32> to vector<1x32xf32>
    %29 = vector.broadcast %27 : vector<64x1xf32> to vector<64x32xf32>
    %30 = vector.broadcast %28 : vector<1x32xf32> to vector<64x32xf32>
    %31 = arith.mulf %29, %30 : vector<64x32xf32>
    %32 = arith.addf %26, %31 : vector<64x32xf32>
    %33 = vector.extract_strided_slice %3 {offsets = [1, 0], sizes = [1, 32], strides = [1, 1]} : vector<8x32xf32> to vector<1x32xf32>
    %34 = vector.broadcast %33 : vector<1x32xf32> to vector<64x32xf32>
    %35 = arith.addf %32, %34 : vector<64x32xf32>
    %36 = vector.extract_strided_slice %6 {offsets = [2, 0], sizes = [1, 32], strides = [1, 1]} : vector<40x32xf32> to vector<1x32xf32>
    %37 = vector.extract_strided_slice %6 {offsets = [3, 0], sizes = [1, 32], strides = [1, 1]} : vector<40x32xf32> to vector<1x32xf32>
    %38 = vector.extract_strided_slice %6 {offsets = [4, 0], sizes = [1, 32], strides = [1, 1]} : vector<40x32xf32> to vector<1x32xf32>
    %39 = vector.extract_strided_slice %6 {offsets = [5, 0], sizes = [1, 32], strides = [1, 1]} : vector<40x32xf32> to vector<1x32xf32>
    %40 = vector.extract_strided_slice %6 {offsets = [6, 0], sizes = [1, 32], strides = [1, 1]} : vector<40x32xf32> to vector<1x32xf32>
    %41 = vector.extract_strided_slice %6 {offsets = [8, 0], sizes = [32, 32], strides = [1, 1]} : vector<40x32xf32> to vector<32x32xf32>
    %cst = arith.constant dense<0.000000e+00> : vector<64xf32>
    %42 = vector.multi_reduction <add>, %21, %cst [1] : vector<64x32xf32> to vector<64xf32>
    %43 = vector.shape_cast %42 : vector<64xf32> to vector<64x1xf32>
    %cst_9 = arith.constant 3.200000e+01 : f32
    %44 = vector.broadcast %cst_9 : f32 to vector<64x1xf32>
    %45 = arith.divf %43, %44 : vector<64x1xf32>
    %46 = arith.mulf %21, %21 : vector<64x32xf32>
    %cst_10 = arith.constant dense<0.000000e+00> : vector<64xf32>
    %47 = vector.multi_reduction <add>, %46, %cst_10 [1] : vector<64x32xf32> to vector<64xf32>
    %48 = vector.shape_cast %47 : vector<64xf32> to vector<64x1xf32>
    %cst_11 = arith.constant 3.200000e+01 : f32
    %49 = vector.broadcast %cst_11 : f32 to vector<64x1xf32>
    %50 = arith.divf %48, %49 : vector<64x1xf32>
    %51 = arith.mulf %45, %45 : vector<64x1xf32>
    %52 = arith.subf %50, %51 : vector<64x1xf32>
    %53 = vector.broadcast %45 : vector<64x1xf32> to vector<64x32xf32>
    %54 = arith.subf %21, %53 : vector<64x32xf32>
    %cst_12 = arith.constant 9.99999974E-6 : f32
    %55 = vector.broadcast %cst_12 : f32 to vector<64x1xf32>
    %56 = arith.addf %52, %55 : vector<64x1xf32>
    %57 = math.rsqrt %56 : vector<64x1xf32>
    %58 = vector.broadcast %57 : vector<64x1xf32> to vector<64x32xf32>
    %59 = arith.mulf %54, %58 : vector<64x32xf32>
    %60 = vector.broadcast %36 : vector<1x32xf32> to vector<64x32xf32>
    %61 = arith.mulf %59, %60 : vector<64x32xf32>
    %62 = vector.broadcast %37 : vector<1x32xf32> to vector<64x32xf32>
    %63 = arith.addf %61, %62 : vector<64x32xf32>
    %cst_13 = arith.constant 0.000000e+00 : f32
    %64 = vector.broadcast %cst_13 : f32 to vector<64x32xf32>
    %65 = arith.maximumf %63, %64 : vector<64x32xf32>
    %cst_14 = arith.constant dense<0.000000e+00> : vector<64x32xf32>
    %66 = tpu.matmul %65, %41, %cst_14 {dimension_numbers = #tpu.dot_dimension_numbers<[1], [0], [0], [1], [0, 0, 1, 1], [], []>} : vector<64x32xf32>, vector<32x32xf32>, vector<64x32xf32> -> vector<64x32xf32>
    %67 = vector.broadcast %38 : vector<1x32xf32> to vector<64x32xf32>
    %68 = arith.addf %66, %67 : vector<64x32xf32>
    %cst_15 = arith.constant dense<0.000000e+00> : vector<64xf32>
    %69 = vector.multi_reduction <add>, %68, %cst_15 [1] : vector<64x32xf32> to vector<64xf32>
    %70 = vector.shape_cast %69 : vector<64xf32> to vector<64x1xf32>
    %cst_16 = arith.constant 3.200000e+01 : f32
    %71 = vector.broadcast %cst_16 : f32 to vector<64x1xf32>
    %72 = arith.divf %70, %71 : vector<64x1xf32>
    %73 = arith.mulf %68, %68 : vector<64x32xf32>
    %cst_17 = arith.constant dense<0.000000e+00> : vector<64xf32>
    %74 = vector.multi_reduction <add>, %73, %cst_17 [1] : vector<64x32xf32> to vector<64xf32>
    %75 = vector.shape_cast %74 : vector<64xf32> to vector<64x1xf32>
    %cst_18 = arith.constant 3.200000e+01 : f32
    %76 = vector.broadcast %cst_18 : f32 to vector<64x1xf32>
    %77 = arith.divf %75, %76 : vector<64x1xf32>
    %78 = arith.mulf %72, %72 : vector<64x1xf32>
    %79 = arith.subf %77, %78 : vector<64x1xf32>
    %80 = vector.broadcast %72 : vector<64x1xf32> to vector<64x32xf32>
    %81 = arith.subf %68, %80 : vector<64x32xf32>
    %cst_19 = arith.constant 9.99999974E-6 : f32
    %82 = vector.broadcast %cst_19 : f32 to vector<64x1xf32>
    %83 = arith.addf %79, %82 : vector<64x1xf32>
    %84 = math.rsqrt %83 : vector<64x1xf32>
    %85 = vector.broadcast %84 : vector<64x1xf32> to vector<64x32xf32>
    %86 = arith.mulf %81, %85 : vector<64x32xf32>
    %87 = vector.broadcast %39 : vector<1x32xf32> to vector<64x32xf32>
    %88 = arith.mulf %86, %87 : vector<64x32xf32>
    %89 = vector.broadcast %40 : vector<1x32xf32> to vector<64x32xf32>
    %90 = arith.addf %88, %89 : vector<64x32xf32>
    %cst_20 = arith.constant 0.000000e+00 : f32
    %91 = vector.broadcast %cst_20 : f32 to vector<64x32xf32>
    %92 = arith.maximumf %90, %91 : vector<64x32xf32>
    %93 = vector.extract_strided_slice %7 {offsets = [2, 0], sizes = [1, 32], strides = [1, 1]} : vector<40x32xf32> to vector<1x32xf32>
    %94 = vector.extract_strided_slice %7 {offsets = [3, 0], sizes = [1, 32], strides = [1, 1]} : vector<40x32xf32> to vector<1x32xf32>
    %95 = vector.extract_strided_slice %7 {offsets = [4, 0], sizes = [1, 32], strides = [1, 1]} : vector<40x32xf32> to vector<1x32xf32>
    %96 = vector.extract_strided_slice %7 {offsets = [5, 0], sizes = [1, 32], strides = [1, 1]} : vector<40x32xf32> to vector<1x32xf32>
    %97 = vector.extract_strided_slice %7 {offsets = [6, 0], sizes = [1, 32], strides = [1, 1]} : vector<40x32xf32> to vector<1x32xf32>
    %98 = vector.extract_strided_slice %7 {offsets = [8, 0], sizes = [32, 32], strides = [1, 1]} : vector<40x32xf32> to vector<32x32xf32>
    %cst_21 = arith.constant dense<0.000000e+00> : vector<64xf32>
    %99 = vector.multi_reduction <add>, %35, %cst_21 [1] : vector<64x32xf32> to vector<64xf32>
    %100 = vector.shape_cast %99 : vector<64xf32> to vector<64x1xf32>
    %cst_22 = arith.constant 3.200000e+01 : f32
    %101 = vector.broadcast %cst_22 : f32 to vector<64x1xf32>
    %102 = arith.divf %100, %101 : vector<64x1xf32>
    %103 = arith.mulf %35, %35 : vector<64x32xf32>
    %cst_23 = arith.constant dense<0.000000e+00> : vector<64xf32>
    %104 = vector.multi_reduction <add>, %103, %cst_23 [1] : vector<64x32xf32> to vector<64xf32>
    %105 = vector.shape_cast %104 : vector<64xf32> to vector<64x1xf32>
    %cst_24 = arith.constant 3.200000e+01 : f32
    %106 = vector.broadcast %cst_24 : f32 to vector<64x1xf32>
    %107 = arith.divf %105, %106 : vector<64x1xf32>
    %108 = arith.mulf %102, %102 : vector<64x1xf32>
    %109 = arith.subf %107, %108 : vector<64x1xf32>
    %110 = vector.broadcast %102 : vector<64x1xf32> to vector<64x32xf32>
    %111 = arith.subf %35, %110 : vector<64x32xf32>
    %cst_25 = arith.constant 9.99999974E-6 : f32
    %112 = vector.broadcast %cst_25 : f32 to vector<64x1xf32>
    %113 = arith.addf %109, %112 : vector<64x1xf32>
    %114 = math.rsqrt %113 : vector<64x1xf32>
    %115 = vector.broadcast %114 : vector<64x1xf32> to vector<64x32xf32>
    %116 = arith.mulf %111, %115 : vector<64x32xf32>
    %117 = vector.broadcast %93 : vector<1x32xf32> to vector<64x32xf32>
    %118 = arith.mulf %116, %117 : vector<64x32xf32>
    %119 = vector.broadcast %94 : vector<1x32xf32> to vector<64x32xf32>
    %120 = arith.addf %118, %119 : vector<64x32xf32>
    %cst_26 = arith.constant 0.000000e+00 : f32
    %121 = vector.broadcast %cst_26 : f32 to vector<64x32xf32>
    %122 = arith.maximumf %120, %121 : vector<64x32xf32>
    %cst_27 = arith.constant dense<0.000000e+00> : vector<64x32xf32>
    %123 = tpu.matmul %122, %98, %cst_27 {dimension_numbers = #tpu.dot_dimension_numbers<[1], [0], [0], [1], [0, 0, 1, 1], [], []>} : vector<64x32xf32>, vector<32x32xf32>, vector<64x32xf32> -> vector<64x32xf32>
    %124 = vector.broadcast %95 : vector<1x32xf32> to vector<64x32xf32>
    %125 = arith.addf %123, %124 : vector<64x32xf32>
    %cst_28 = arith.constant dense<0.000000e+00> : vector<64xf32>
    %126 = vector.multi_reduction <add>, %125, %cst_28 [1] : vector<64x32xf32> to vector<64xf32>
    %127 = vector.shape_cast %126 : vector<64xf32> to vector<64x1xf32>
    %cst_29 = arith.constant 3.200000e+01 : f32
    %128 = vector.broadcast %cst_29 : f32 to vector<64x1xf32>
    %129 = arith.divf %127, %128 : vector<64x1xf32>
    %130 = arith.mulf %125, %125 : vector<64x32xf32>
    %cst_30 = arith.constant dense<0.000000e+00> : vector<64xf32>
    %131 = vector.multi_reduction <add>, %130, %cst_30 [1] : vector<64x32xf32> to vector<64xf32>
    %132 = vector.shape_cast %131 : vector<64xf32> to vector<64x1xf32>
    %cst_31 = arith.constant 3.200000e+01 : f32
    %133 = vector.broadcast %cst_31 : f32 to vector<64x1xf32>
    %134 = arith.divf %132, %133 : vector<64x1xf32>
    %135 = arith.mulf %129, %129 : vector<64x1xf32>
    %136 = arith.subf %134, %135 : vector<64x1xf32>
    %137 = vector.broadcast %129 : vector<64x1xf32> to vector<64x32xf32>
    %138 = arith.subf %125, %137 : vector<64x32xf32>
    %cst_32 = arith.constant 9.99999974E-6 : f32
    %139 = vector.broadcast %cst_32 : f32 to vector<64x1xf32>
    %140 = arith.addf %136, %139 : vector<64x1xf32>
    %141 = math.rsqrt %140 : vector<64x1xf32>
    %142 = vector.broadcast %141 : vector<64x1xf32> to vector<64x32xf32>
    %143 = arith.mulf %138, %142 : vector<64x32xf32>
    %144 = vector.broadcast %96 : vector<1x32xf32> to vector<64x32xf32>
    %145 = arith.mulf %143, %144 : vector<64x32xf32>
    %146 = vector.broadcast %97 : vector<1x32xf32> to vector<64x32xf32>
    %147 = arith.addf %145, %146 : vector<64x32xf32>
    %cst_33 = arith.constant 0.000000e+00 : f32
    %148 = vector.broadcast %cst_33 : f32 to vector<64x32xf32>
    %149 = arith.maximumf %147, %148 : vector<64x32xf32>
    %150 = tpu.concatenate %92, %149 in 1 : vector<64x32xf32>, vector<64x32xf32> -> vector<64x64xf32>
    %151 = vector.extract_strided_slice %5 {offsets = [0, 0], sizes = [64, 128], strides = [1, 1]} : vector<72x128xf32> to vector<64x128xf32>
    %cst_34 = arith.constant dense<0.000000e+00> : vector<64x128xf32>
    %152 = tpu.matmul %150, %151, %cst_34 {dimension_numbers = #tpu.dot_dimension_numbers<[1], [0], [0], [1], [0, 0, 1, 1], [], []>} : vector<64x64xf32>, vector<64x128xf32>, vector<64x128xf32> -> vector<64x128xf32>
    %153 = vector.extract_strided_slice %5 {offsets = [64, 0], sizes = [1, 128], strides = [1, 1]} : vector<72x128xf32> to vector<1x128xf32>
    %154 = vector.broadcast %153 : vector<1x128xf32> to vector<64x128xf32>
    %155 = arith.addf %152, %154 : vector<64x128xf32>
    %c0_35 = arith.constant 0 : index
    %c0_36 = arith.constant 0 : index
    %c0_37 = arith.constant 0 : index
    %156 = vector.load %arg6[%c0_35, %c0_36, %c0_37] : memref<1x64x128xf32, #tpu.memory_space<vmem>>, vector<1x64x128xf32>
    %157 = vector.shape_cast %156 : vector<1x64x128xf32> to vector<64x128xf32>
    %158 = vector.shape_cast %155 : vector<64x128xf32> to vector<1x64x128xf32>
    tpu.vector_store %arg6[%c0_35, %c0_36, %c0_37], %158 {strides = array<i32>} : memref<1x64x128xf32, #tpu.memory_space<vmem>>, vector<1x64x128xf32>,
    return
  }
  func.func @transform_0(%arg0: i32, %arg1: i32) -> (i32, i32, i32) {
    %c0_i32 = arith.constant 0 : i32
    %c0_i32_0 = arith.constant 0 : i32
    return %arg0, %arg1, %c0_i32 : i32, i32, i32
  }
  func.func @transform_1(%arg0: i32, %arg1: i32) -> (i32, i32, i32) {
    %c0_i32 = arith.constant 0 : i32
    %c0_i32_0 = arith.constant 0 : i32
    %c0_i32_1 = arith.constant 0 : i32
    return %arg0, %c0_i32, %c0_i32_0 : i32, i32, i32
  }
  func.func @transform_2(%arg0: i32, %arg1: i32) -> (i32, i32) {
    %c0_i32 = arith.constant 0 : i32
    %c0_i32_0 = arith.constant 0 : i32
    %c0_i32_1 = arith.constant 0 : i32
    return %c0_i32, %c0_i32_0 : i32, i32
  }
  func.func @transform_3(%arg0: i32, %arg1: i32) -> (i32, i32) {
    %c0_i32 = arith.constant 0 : i32
    %c0_i32_0 = arith.constant 0 : i32
    %c0_i32_1 = arith.constant 0 : i32
    return %c0_i32, %c0_i32_0 : i32, i32
  }
  func.func @transform_4(%arg0: i32, %arg1: i32) -> (i32, i32, i32) {
    %c0_i32 = arith.constant 0 : i32
    %c0_i32_0 = arith.constant 0 : i32
    return %arg0, %arg1, %c0_i32 : i32, i32, i32
  }
}

</mosaic_0001>

<bundles_post_ra>
// kernel: tpu_custom_call.1
= control target key start
LH: loop header
LB: loop body
LE: loop exit
PB: predicated region body
PF: predicated region fallthrough
CT: control target
= control target key end

     0   :  { %9 = vsyncpa [#allocation3], 0  ;;  %s2830_s0 = inlined_call_operand.vmem [shape: f32[2,64,2], index: 0, kind: input, shape index: {}]   ;;  %s2831_s1 = inlined_call_operand.vmem [shape: f32[2,8,32], index: 1, kind: input, shape index: {}]   ;;  %s2832_s2 = inlined_call_operand.vmem [shape: f32[80,32], index: 2, kind: input, shape index: {}]   ;;  %s2833_s3 = inlined_call_operand.vmem [shape: f32[72,128], index: 3, kind: input, shape index: {}]   ;;  %s2834_s4 = inlined_call_operand.hbm [shape: f32[2,64,128], index: 4, kind: output, shape index: {}]  }
   0x1   :  { %11 = vsyncpa [#allocation3 + $0x1], 0  ;;  %s2027_s15 = smov 0   ;;  %s2029_s16 = smov 0  }
   0x2   :  { %s2031_s17 = smov 0   ;;  %s2033_s18 = smov 0  }
   0x3   :  { %s2035_s19 = smov 0   ;;  %s2037_s20 = smov 0  }
   0x4 LB: > { %s1597_s21 = sadd.s32 4294967295, %s1994_s20   ;;  %s1598_s22 = sadd.s32 4294967294, %s1994_s20   ;;  %s1994_s20 = sphi %s2037_s20, %s17_s20   ;;  %s1990_s19 = sphi %s2035_s19, %s2841_s19   ;;  %s1986_s18 = sphi %s2033_s18, %s2840_s18   ;;  %s1982_s17 = sphi %s2031_s17, %s2839_s17   ;;  %s1978_s16 = sphi %s2029_s16, %s2838_s16   ;;  %s1974_s15 = sphi %s2027_s15, %s2837_s15  }
   0x5   : > { %s29_s23 = sadd.s32 1, %s1990_s19  ;;  %s134_s24 = sadd.s32 1, %s1982_s17 }
   0x6   : > { %p31_p0 = scmp.ge.s32.totalorder %s29_s23, 2  ;;  %p144_p1 = scmp.ne.s32.totalorder %s1982_s17, %s1978_s16 }
   0x7   : > { %p145_p2 = scmp.eq.s32.totalorder %s1597_s21, 1  ;;  %p150_p3 = scmp.ne.s32.totalorder %s1978_s16, %s1974_s15 }
   0x8   : > { %s2843_s23 = smov (%p31_p0, %s29_s23), 0  ;;  %p151_p5 = scmp.eq.s32.totalorder %s1598_s22, 1 }
   0x9   : > { %p2067_p4 = por %p145_p2, %p144_p1  ;;  %s129_s26 = ssub.s32 %s1990_s19, %s2843_s23 }
   0xa   : > { %p1601_p6 = scmp.ge.s32.totalorder %s1994_s20, 1  ;;  %p132_p7 = scmp.eq.s32.totalorder %s129_s26, 0 }
   0xb   : > { %p2074_p8 = por %p151_p5, %p150_p3  ;;  %p195_p9 = scmp.lt.s32.totalorder %s1994_s20, 3 }
   0xc   : > { %s2080_s28 = scalar_select %p132_p7, %s1982_s17, %s134_s24  }
   0xd   : > { %p196_p10 = pnand %p1601_p6, %p195_p9 }
   0xe   : > { %p230_p11 = scmp.lt.s32.totalorder (!%p196_p10), %s1986_s18, 1  ;;  %v1996_v0 = vmov (!%p196_p10), 0   ;;  %v1997_v3 = vmov (!%p196_p10), 1   ;;  %v312_v10 = vlaneseq (!%p196_p10)  ;;  %v2105_v14 = vld [vmem:[%s2832_s2 + $0x28] sm:$0xff] (!%p196_p10)  ;;  %vm432_vm0 = vcmask (!%p196_p10), 261120   ;;  %s1998_s26 = smov (!%p196_p10), 32  }
   0xf   : > { %199 = sbr.rel (%p196_p10) target bundleno = 1127 (0x467), region = 36  ;;  %1847 = vset.pattern.permute.xlu1 (!%p196_p10), %v1996_v0  ;;  %1845 = vset.pattern.permute.xlu0 (!%p196_p10), %v1996_v0  ;;  %vm1352_vm1 = vcmask (!%p196_p10), 523264   ;;  %s226_s5 = sand.u32 (!%p196_p10), 1, %s1978_s16  }
  0x10   : > { %v2090_v11 = vshrl.u32 (!%p196_p10), %v312_v10, 7  ;;  %s1636_s10 = sshll.u32 (!%p196_p10), %s1986_s18, 10  ;;  %s2784_s21 = scalar_lea.sflag (!%p196_p10), [#allocation3], %s226_s5 }
  0x11   : > { %s2778_s14 = scalar_lea.hbm (!%p196_p10), %s2834_s4, %s1636_s10  ;;  %s1999_s22 = smov (!%p196_p10), [#allocation2]  }
  0x12   : > { %v2094_v12 = vsub.s32 (!%p196_p10), 0, %v2090_v11  ;;  %v2097_v13 = vsub.s32 (!%p196_p10), 1, %v2090_v11  ;;  %s1920_s24 = sshll.u32 (!%p196_p10), %s1999_s22, 4  ;;  %s1921_s24 = int_to_ptr.vmem [resolvable:$false] %s1920_s24 }
  0x14   : > { %v403_v18 = vrot.slane (!%p196_p10), %v2105_v14, %v2097_v13  ;;  %v391_v19 = vrot.slane (!%p196_p10), %v2105_v14, %v2094_v12 }
  0x16   : > { %s2084_s29 = scalar_select %p230_p11, %s1986_s18, 1 }
  0x18   : > { %s1635_s30 = sshll.u32 %s2084_s29, 6  ;;  %s1605_s8 = sshll.u32 %s2084_s29, 3 }
  0x19   : > { %s237_s7 = scalar_lea.vmem %s2830_s0, %s1635_s30  ;;  %s242_s11 = scalar_lea.vmem %s2831_s1, %s1605_s8 }
  0x1a   : > { %v245_v1 = vld [vmem:[%s237_s7 + $0x8] sm:$0xff]  ;;  %v244_v2 = vld [vmem:[%s237_s7] sm:$0xff]  ;;  %v246_v4 = vld [vmem:[%s237_s7 + $0x10] sm:$0xff]  ;;  %s1602_s8 = sshll.u32 %s226_s5, 6 }
  0x1b   : > { %279 = vperm.xlu1 %1847, %v245_v1   ;;  %274 = vperm.xlu0 %1845, %v244_v2   ;;  %v247_v5 = vld [vmem:[%s237_s7 + $0x18] sm:$0xff]  ;;  %v248_v6 = vld [vmem:[%s237_s7 + $0x20] sm:$0xff]  ;;  %v249_v7 = vld [vmem:[%s237_s7 + $0x28] sm:$0xff]  ;;  %s228_s9 = scalar_lea.vmem [#allocation2], %s1602_s8 }
  0x1c   : > { %v250_v8 = vld [vmem:[%s237_s7 + $0x30] sm:$0xff]  ;;  %v251_v9 = vld [vmem:[%s237_s7 + $0x38] sm:$0xff]  ;;  %v2111_v17 = vld [vmem:[%s242_s11] sm:$0xff]  ;;  %s1506_s11 = sshll.u32 %s228_s9, 4  ;;  %s2780_s11 = int_to_ptr.vmem [resolvable:$true] %s1506_s11 }
  0x1d   : > { %v2119_v20 = vrot.slane %v2111_v17, %v2097_v13  ;;  %s1916_s18 = scalar_lea.vmem %s2780_s11, 1024  ;;  %p1923_p1 = scmp.lt.s32.totalorder %s2780_s11, %s1921_s24 }
  0x1e   : > { %p1917_p12 = scmp.ne.s32.totalorder %s2780_s11, %s1916_s18 }
  0x1f   : > { %1848 = vset.pattern.permute.xlu1 %v1997_v3  ;;  %1846 = vset.pattern.permute.xlu0 %v1997_v3 }
  0x20   : > { %329 = vperm.xlu1 %1848, %v245_v1   ;;  %325 = vperm.xlu0 %1846, %v244_v2   ;;  %p1918_p13 = pnand %p1917_p12, %p2067_p4 }
  0x22   : > { %p1919_p0 = pneg %p1918_p13 }
  0x24   : > { %1849 = vset.pattern.permute.xlu1 %v1996_v0  ;;  %333 = vperm.xlu0 %1846, %v246_v4  }
  0x25   : > { %284 = vperm.xlu1 %1849, %v246_v4  }
  0x28   : > { %337 = vperm.xlu0 %1846, %v247_v5  }
  0x29   : > { %289 = vperm.xlu1 %1849, %v247_v5  }
  0x2c   : > { %341 = vperm.xlu0 %1846, %v248_v6  }
  0x2d   : > { %294 = vperm.xlu1 %1849, %v248_v6  }
  0x30   : > { %345 = vperm.xlu0 %1846, %v249_v7  }
  0x31   : > { %299 = vperm.xlu1 %1849, %v249_v7   ;;  %v2201_v7 = vld [vmem:[%s2832_s2] sm:$0xff] }
  0x34   : > { %349 = vperm.xlu0 %1846, %v250_v8  }
  0x35   : > { %304 = vperm.xlu1 %1849, %v250_v8  }
  0x38   : > { %353 = vperm.xlu0 %1846, %v251_v9  }
  0x39   : > { %309 = vperm.xlu1 %1849, %v251_v9  }
  0x9a   : > { %v2107_v15 = vpop.permute.xlu1 %279  ;;  %v2109_v16 = vpop.permute.xlu0 %274 }
  0x9b   : > { %v393_v23 = vmul.f32 %v391_v19, %v2107_v15  ;;  %v392_v24 = vmul.f32 %v391_v19, %v2109_v16 }
  0x9f   : > { %v2121_v21 = vpop.permute.xlu1 %329  ;;  %v2123_v22 = vpop.permute.xlu0 %325 }
  0xa0   : > { %v405_v25 = vmul.f32 %v403_v18, %v2121_v21  ;;  %v404_v26 = vmul.f32 %v403_v18, %v2123_v22 }
  0xa2   : > { %v413_v27 = vadd.f32 %v405_v25, %v393_v23  ;;  %v412_v28 = vadd.f32 %v404_v26, %v392_v24  ;;  %v315_v23 = vrot.slane %v2201_v7, %v2094_v12 }
  0xa3   : > { %v2129_v29 = vpop.permute.xlu0 %333 }
  0xa4   : > { %v406_v30 = vmul.f32 %v403_v18, %v2129_v29  ;;  %v2132_v31 = vpop.permute.xlu1 %284  ;;  %v2135_v32 = vadd.f32 %v2119_v20, %v413_v27  ;;  %v2138_v33 = vadd.f32 %v2119_v20, %v412_v28 }
  0xa5   : > { %v394_v34 = vmul.f32 %v391_v19, %v2132_v31 }
  0xa6   : > { %v874_v35 = vsel %vm432_vm0, %v2135_v32, 0.0  ;;  %v871_v36 = vsel %vm432_vm0, %v2138_v33, 0.0  ;;  %v903_v10 = vmul.f32 %v2138_v33, %v2138_v33  ;;  %v904_v27 = vmul.f32 %v2135_v32, %v2135_v32 }
  0xa7   : > { %v414_v37 = vadd.f32 %v406_v30, %v394_v34  ;;  %875 = vadd.xlane.f32.xlu0 %v874_v35  ;;  %872 = vadd.xlane.f32.xlu1 %v871_v36  ;;  %v2145_v38 = vpop.permute.xlu0 %337  ;;  %v379_v36 = vrot.slane %v2111_v17, %v2094_v12 }
  0xa8   : > { %v407_v39 = vmul.f32 %v403_v18, %v2145_v38  ;;  %v2148_v40 = vpop.permute.xlu1 %289  ;;  %v911_v24 = vsel %vm432_vm0, %v903_v10, 0.0  ;;  %v914_v30 = vsel %vm432_vm0, %v904_v27, 0.0 }
  0xa9   : > { %v395_v41 = vmul.f32 %v391_v19, %v2148_v40  ;;  %v2152_v42 = vadd.f32 %v2119_v20, %v414_v37 }
  0xab   : > { %v415_v43 = vadd.f32 %v407_v39, %v395_v41  ;;  %v2154_v44 = vpop.permute.xlu0 %341  ;;  %v877_v45 = vsel %vm432_vm0, %v2152_v42, 0.0  ;;  %v905_v26 = vmul.f32 %v2152_v42, %v2152_v42  ;;  %v318_v39 = vmul.f32 %v315_v23, %v2132_v31 }
  0xac   : > { %v408_v46 = vmul.f32 %v403_v18, %v2154_v44  ;;  %v2159_v47 = vpop.permute.xlu1 %294  ;;  %878 = vadd.xlane.f32.xlu0 %v877_v45  ;;  %v317_v41 = vmul.f32 %v315_v23, %v2107_v15  ;;  %v319_v15 = vmul.f32 %v315_v23, %v2148_v40 }
  0xad   : > { %v396_v48 = vmul.f32 %v391_v19, %v2159_v47  ;;  %v2163_v49 = vadd.f32 %v2119_v20, %v415_v43  ;;  %v917_v28 = vsel %vm432_vm0, %v905_v26, 0.0 }
  0xaf   : > { %v416_v50 = vadd.f32 %v408_v46, %v396_v48  ;;  %v2165_v51 = vpop.permute.xlu0 %345  ;;  %v880_v52 = vsel %vm432_vm0, %v2163_v49, 0.0  ;;  %v906_v35 = vmul.f32 %v2163_v49, %v2163_v49 }
  0xb0   : > { %v409_v53 = vmul.f32 %v403_v18, %v2165_v51  ;;  %v2170_v54 = vpop.permute.xlu1 %299  ;;  %881 = vadd.xlane.f32.xlu1 %v880_v52  ;;  %v320_v52 = vmul.f32 %v315_v23, %v2159_v47 }
  0xb1   : > { %v397_v55 = vmul.f32 %v391_v19, %v2170_v54  ;;  %v2174_v56 = vadd.f32 %v2119_v20, %v416_v50  ;;  %v920_v45 = vsel %vm432_vm0, %v906_v35, 0.0  ;;  %v321_v47 = vmul.f32 %v315_v23, %v2170_v54 }
  0xb3   : > { %v417_v57 = vadd.f32 %v409_v53, %v397_v55  ;;  %v2176_v58 = vpop.permute.xlu0 %349  ;;  %v883_v59 = vsel %vm432_vm0, %v2174_v56, 0.0  ;;  %v907_v34 = vmul.f32 %v2174_v56, %v2174_v56 }
  0xb4   : > { %v410_v60 = vmul.f32 %v403_v18, %v2176_v58  ;;  %v2181_v61 = vpop.permute.xlu1 %304  ;;  %884 = vadd.xlane.f32.xlu0 %v883_v59 }
  0xb5   : > { %v398_v62 = vmul.f32 %v391_v19, %v2181_v61  ;;  %v2185_v63 = vadd.f32 %v2119_v20, %v417_v57  ;;  %v923_v43 = vsel %vm432_vm0, %v907_v34, 0.0 }
  0xb7   : > { %v418_v0 = vadd.f32 %v410_v60, %v398_v62  ;;  %v2187_v1 = vpop.permute.xlu0 %353  ;;  %v886_v2 = vsel %vm432_vm0, %v2185_v63, 0.0  ;;  %v908_v17 = vmul.f32 %v2185_v63, %v2185_v63 }
  0xb8   : > { %v411_v3 = vmul.f32 %v403_v18, %v2187_v1  ;;  %v2192_v4 = vpop.permute.xlu1 %309  ;;  %887 = vadd.xlane.f32.xlu1 %v886_v2  ;;  %v359_v18 = vrot.slane %v2201_v7, %v2097_v13  ;;  %v322_v2 = vmul.f32 %v315_v23, %v2181_v61 }
  0xb9   : > { %v399_v5 = vmul.f32 %v391_v19, %v2192_v4  ;;  %v2196_v6 = vadd.f32 %v2119_v20, %v418_v0  ;;  %v926_v55 = vsel %vm432_vm0, %v908_v17, 0.0  ;;  %v323_v61 = vmul.f32 %v315_v23, %v2192_v4 }
  0xba   : > { %v360_v13 = vmul.f32 %v359_v18, %v2123_v22  ;;  %v361_v37 = vmul.f32 %v359_v18, %v2121_v21  ;;  %v364_v31 = vmul.f32 %v359_v18, %v2154_v44  ;;  %v365_v44 = vmul.f32 %v359_v18, %v2165_v51 }
  0xbb   : > { %v419_v8 = vadd.f32 %v411_v3, %v399_v5  ;;  %v889_v9 = vsel %vm432_vm0, %v2196_v6, 0.0  ;;  %v909_v46 = vmul.f32 %v2196_v6, %v2196_v6  ;;  %v366_v0 = vmul.f32 %v359_v18, %v2176_v58 }
  0xbc   : > { %890 = vadd.xlane.f32.xlu0 %v889_v9  ;;  %v369_v21 = vadd.f32 %v361_v37, %v317_v41  ;;  %v372_v40 = vadd.f32 %v364_v31, %v320_v52  ;;  %v373_v10 = vadd.f32 %v365_v44, %v321_v47  ;;  %v367_v58 = vmul.f32 %v359_v18, %v2187_v1 }
  0xbd   : > { %v2210_v19 = vadd.f32 %v2119_v20, %v419_v8  ;;  %v316_v20 = vmul.f32 %v315_v23, %v2109_v16  ;;  %v362_v16 = vmul.f32 %v359_v18, %v2129_v29  ;;  %v363_v29 = vmul.f32 %v359_v18, %v2145_v38 }
  0xbe   : > { %v929_v53 = vsel %vm432_vm0, %v909_v46, 0.0  ;;  %v2253_v60 = vadd.f32 %v379_v36, %v369_v21  ;;  %v2266_v9 = vadd.f32 %v379_v36, %v372_v40  ;;  %v374_v54 = vadd.f32 %v366_v0, %v322_v2  ;;  %v261_v21 = vld [vmem:[%s2832_s2 + $0x40] sm:$0xff] }
  0xbf   : > { %v892_v25 = vsel %vm432_vm0, %v2210_v19, 0.0  ;;  %v368_v22 = vadd.f32 %v360_v13, %v316_v20  ;;  %v370_v48 = vadd.f32 %v362_v16, %v318_v39  ;;  %v910_v57 = vmul.f32 %v2210_v19, %v2210_v19  ;;  %v259_v16 = vld [vmem:[%s2832_s2 + $0x30] sm:$0xff]  ;;  %v260_v39 = vld [vmem:[%s2832_s2 + $0x38] sm:$0xff]  ;;  %v257_v40 = vld [vmem:[%s2832_s2 + $0x20] sm:$0xff] }
  0xc0   : > { %912 = vadd.xlane.f32.xlu0 %v911_v24  ;;  %893 = vadd.xlane.f32.xlu1 %v892_v25  ;;  %v371_v38 = vadd.f32 %v363_v29, %v319_v15  ;;  %v436_v8 = vsel %vm432_vm0, %v2253_v60, 0.0  ;;  %v375_v25 = vadd.f32 %v367_v58, %v323_v61  ;;  %v445_v26 = vsel %vm432_vm0, %v2266_v9, 0.0 }
  0xc1   : > { %v2241_v50 = vadd.f32 %v379_v36, %v368_v22  ;;  %v2256_v62 = vadd.f32 %v379_v36, %v370_v48  ;;  %v932_v3 = vsel %vm432_vm0, %v910_v57, 0.0  ;;  %v2276_v27 = vadd.f32 %v379_v36, %v374_v54  ;;  %v262_v48 = vld [vmem:[%s2832_s2 + $0x48] sm:$0xff]  ;;  %v255_v57 = vld [vmem:[%s2832_s2 + $0x10] sm:$0xff] }
  0xc2   : > { %v2268_v51 = vadd.f32 %v379_v36, %v371_v38  ;;  %v2278_v13 = vadd.f32 %v379_v36, %v373_v10  ;;  %v2286_v23 = vadd.f32 %v379_v36, %v375_v25  ;;  %v467_v34 = vmul.f32 %v2253_v60, %v2253_v60 }
  0xc3   : > { %v433_v59 = vsel %vm432_vm0, %v2241_v50, 0.0  ;;  %v439_v5 = vsel %vm432_vm0, %v2256_v62, 0.0  ;;  %v451_v1 = vsel %vm432_vm0, %v2276_v27, 0.0  ;;  %v466_v18 = vmul.f32 %v2241_v50, %v2241_v50 }
  0xc4   : > { %918 = vadd.xlane.f32.xlu0 %v917_v28  ;;  %915 = vadd.xlane.f32.xlu1 %v914_v30  ;;  %v442_v24 = vsel %vm432_vm0, %v2268_v51, 0.0  ;;  %v448_v4 = vsel %vm432_vm0, %v2278_v13, 0.0  ;;  %v454_v28 = vsel %vm432_vm0, %v2286_v23, 0.0  ;;  %v468_v30 = vmul.f32 %v2256_v62, %v2256_v62 }
  0xc5   : > { %v474_v20 = vsel %vm432_vm0, %v466_v18, 0.0  ;;  %v477_v36 = vsel %vm432_vm0, %v467_v34, 0.0  ;;  %v470_v37 = vmul.f32 %v2266_v9, %v2266_v9  ;;  %v469_v22 = vmul.f32 %v2268_v51, %v2268_v51 }
  0xc6   : > { %v480_v35 = vsel %vm432_vm0, %v468_v30, 0.0  ;;  %v1753_v41 = vpack.c.bf16 %v260_v39, %v259_v16  ;;  %v472_v46 = vmul.f32 %v2276_v27, %v2276_v27  ;;  %v471_v17 = vmul.f32 %v2278_v13, %v2278_v13 }
  0xc7   : > { %v1757_v29 = vpack.c.bf16 %v262_v48, %v261_v21  ;;  %v473_v52 = vmul.f32 %v2286_v23, %v2286_v23 }
  0xc8   : > { %924 = vadd.xlane.f32.xlu0 %v923_v43  ;;  %921 = vadd.xlane.f32.xlu1 %v920_v45  ;;  %v486_v43 = vsel %vm432_vm0, %v470_v37, 0.0  ;;  %v483_v45 = vsel %vm432_vm0, %v469_v22, 0.0  ;;  %v492_v15 = vsel %vm432_vm0, %v472_v46, 0.0  ;;  %v489_v31 = vsel %vm432_vm0, %v471_v17, 0.0 }
  0xc9   : > { %1754 = vmatprep.subr.bf16.mxu1 %v1753_v41 }
  0xca   : > { %1756 = vmatpush3.bf16.msra.mxu1 %v1753_v41 }
  0xcb   : > { %1758 = vmatprep.subr.bf16.mxu1 %v1757_v29 }
  0xcc   : > { %930 = vadd.xlane.f32.xlu0 %v929_v53  ;;  %927 = vadd.xlane.f32.xlu1 %v926_v55  ;;  %v495_v53 = vsel %vm432_vm0, %v473_v52, 0.0  ;;  %v254_v55 = vld [vmem:[%s2832_s2 + $0x8] sm:$0xff] }
  0xcd   : > { %v1745_v38 = vpack.c.bf16 %v255_v57, %v254_v55  ;;  %v556_v55 = vsub.s32 2, %v2090_v11 }
  0xce   : > { %1760 = vmatpush3.bf16.msra.mxu1 %v1757_v29 }
  0xcf   : > { %1746 = vmatprep.subr.bf16.mxu0 %v1745_v38 }
  0xd0   : > { %434 = vadd.xlane.f32.xlu0 %v433_v59  ;;  %933 = vadd.xlane.f32.xlu1 %v932_v3  ;;  %v256_v59 = vld [vmem:[%s2832_s2 + $0x18] sm:$0xff] }
  0xd1   : > { %v1749_v44 = vpack.c.bf16 %v257_v40, %v256_v59  ;;  %1748 = vmatpush3.bf16.msra.mxu0 %v1745_v38 }
  0xd3   : > { %1750 = vmatprep.subr.bf16.mxu0 %v1749_v44 }
  0xd4   : > { %440 = vadd.xlane.f32.xlu0 %v439_v5  ;;  %437 = vadd.xlane.f32.xlu1 %v436_v8 }
  0xd5   : > { %1752 = vmatpush3.bf16.msra.mxu0 %v1749_v44 }
  0xd8   : > { %446 = vadd.xlane.f32.xlu0 %v445_v26  ;;  %443 = vadd.xlane.f32.xlu1 %v442_v24 }
  0xdc   : > { %452 = vadd.xlane.f32.xlu0 %v451_v1  ;;  %449 = vadd.xlane.f32.xlu1 %v448_v4 }
  0xe0   : > { %475 = vadd.xlane.f32.xlu0 %v474_v20  ;;  %455 = vadd.xlane.f32.xlu1 %v454_v28 }
  0xe4   : > { %481 = vadd.xlane.f32.xlu0 %v480_v35  ;;  %478 = vadd.xlane.f32.xlu1 %v477_v36 }
  0xe8   : > { %487 = vadd.xlane.f32.xlu0 %v486_v43  ;;  %484 = vadd.xlane.f32.xlu1 %v483_v45 }
  0xec   : > { %493 = vadd.xlane.f32.xlu0 %v492_v15  ;;  %490 = vadd.xlane.f32.xlu1 %v489_v31 }
  0xf0   : > { %496 = vadd.xlane.f32.xlu1 %v495_v53 }
 0x134   : > { %v876_v47 = vpop.xlane.xlu0 %875  ;;  %v873_v0 = vpop.xlane.xlu1 %872 }
 0x135   : > { %v895_v54 = vmul.f32 0.03125, %v873_v0  ;;  %v2336_v58 = vmul.f32 0.03125, %v876_v47 }
 0x137   : > { %v943_v25 = vmul.f32 %v895_v54, %v895_v54  ;;  %v944_v18 = vmul.f32 %v2336_v58, %v2336_v58 }
 0x139   : > { %v879_v2 = vpop.xlane.xlu0 %878 }
 0x13a   : > { %v2338_v26 = vmul.f32 0.03125, %v879_v2 }
 0x13c   : > { %v945_v35 = vmul.f32 %v2338_v26, %v2338_v26 }
 0x13d   : > { %v882_v3 = vpop.xlane.xlu1 %881 }
 0x13e   : > { %v2342_v20 = vmul.f32 0.03125, %v882_v3 }
 0x140   : > { %v946_v41 = vmul.f32 %v2342_v20, %v2342_v20 }
 0x141   : > { %v885_v5 = vpop.xlane.xlu0 %884 }
 0x142   : > { %v2344_v28 = vmul.f32 0.03125, %v885_v5  ;;  %v568_v5 = vsub.s32 3, %v2090_v11 }
 0x144   : > { %v947_v43 = vmul.f32 %v2344_v28, %v2344_v28 }
 0x145   : > { %v888_v8 = vpop.xlane.xlu1 %887 }
 0x146   : > { %v2352_v45 = vmul.f32 0.03125, %v888_v8 }
 0x148   : > { %v948_v57 = vmul.f32 %v2352_v45, %v2352_v45 }
 0x149   : > { %v891_v10 = vpop.xlane.xlu0 %890 }
 0x14a   : > { %v2354_v46 = vmul.f32 0.03125, %v891_v10 }
 0x14c   : > { %v949_v59 = vmul.f32 %v2354_v46, %v2354_v46 }
 0x14d   : > { %v894_v61 = vpop.xlane.xlu1 %893  ;;  %v913_v24 = vpop.xlane.xlu0 %912 }
 0x14e   : > { %v935_v1 = vmul.f32 0.03125, %v913_v24  ;;  %v2361_v38 = vmul.f32 0.03125, %v894_v61  ;;  %v959_v24 = vsub.f32 %v2138_v33, %v895_v54  ;;  %v2368_v61 = vrot.slane %v2105_v14, %v556_v55 }
 0x14f   : > { %v2375_v33 = vrot.slane %v2105_v14, %v568_v5 }
 0x150   : > { %v951_v4 = vsub.f32 %v935_v1, %v943_v25 }
 0x151   : > { %v916_v30 = vpop.xlane.xlu1 %915  ;;  %v919_v34 = vpop.xlane.xlu0 %918 }
 0x152   : > { %v967_v36 = vadd.f32 1e-05, %v951_v4  ;;  %v936_v37 = vmul.f32 0.03125, %v916_v30  ;;  %v937_v22 = vmul.f32 0.03125, %v919_v34 }
 0x154   : > { %1850 = vrsqrt.f32 %v967_v36  ;;  %v952_v16 = vsub.f32 %v936_v37, %v944_v18  ;;  %v953_v39 = vsub.f32 %v937_v22, %v945_v35  ;;  %v950_v18 = vmul.f32 %v2361_v38, %v2361_v38 }
 0x155   : > { %v922_v17 = vpop.xlane.xlu1 %921  ;;  %v925_v21 = vpop.xlane.xlu0 %924  ;;  %v960_v37 = vsub.f32 %v2135_v32, %v2336_v58 }
 0x156   : > { %v968_v48 = vadd.f32 1e-05, %v952_v16  ;;  %v969_v29 = vadd.f32 1e-05, %v953_v39  ;;  %v938_v15 = vmul.f32 0.03125, %v922_v17  ;;  %v939_v31 = vmul.f32 0.03125, %v925_v21 }
 0x157   : > { %v961_v21 = vsub.f32 %v2152_v42, %v2338_v26 }
 0x158   : > { %1852 = vrsqrt.f32 %v968_v48  ;;  %v954_v52 = vsub.f32 %v938_v15, %v946_v41  ;;  %v955_v53 = vsub.f32 %v939_v31, %v947_v43  ;;  %v962_v15 = vsub.f32 %v2163_v49, %v2342_v20 }
 0x159   : > { %1854 = vrsqrt.f32 %v969_v29  ;;  %v928_v40 = vpop.xlane.xlu1 %927  ;;  %v931_v44 = vpop.xlane.xlu0 %930  ;;  %v964_v49 = vsub.f32 %v2185_v63, %v2352_v45 }
 0x15a   : > { %v970_v47 = vadd.f32 1e-05, %v954_v52  ;;  %v971_v0 = vadd.f32 1e-05, %v955_v53  ;;  %v940_v2 = vmul.f32 0.03125, %v928_v40  ;;  %v941_v3 = vmul.f32 0.03125, %v931_v44 }
 0x15b   : > { %v963_v40 = vsub.f32 %v2174_v56, %v2344_v28  ;;  %v965_v56 = vsub.f32 %v2196_v6, %v2354_v46 }
 0x15c   : > { %1856 = vrsqrt.f32 %v970_v47  ;;  %v956_v8 = vsub.f32 %v940_v2, %v948_v57  ;;  %v957_v10 = vsub.f32 %v941_v3, %v949_v59 }
 0x15d   : > { %1858 = vrsqrt.f32 %v971_v0  ;;  %v934_v25 = vpop.xlane.xlu1 %933  ;;  %v435_v1 = vpop.xlane.xlu0 %434 }
 0x15e   : > { %v1851_v4 = vpop.eup %1850  ;;  %v972_v30 = vadd.f32 1e-05, %v956_v8  ;;  %v973_v34 = vadd.f32 1e-05, %v957_v10  ;;  %v942_v35 = vmul.f32 0.03125, %v934_v25  ;;  %v2397_v28 = vmul.f32 0.03125, %v435_v1 }
 0x15f   : > { %v983_v36 = vmul.f32 %v1851_v4, %v959_v24 }
 0x160   : > { %1860 = vrsqrt.f32 %v972_v30  ;;  %v958_v54 = vsub.f32 %v942_v35, %v950_v18  ;;  %v966_v18 = vsub.f32 %v2210_v19, %v2361_v38 }
 0x161   : > { %1862 = vrsqrt.f32 %v973_v34  ;;  %v438_v22 = vpop.xlane.xlu1 %437  ;;  %v441_v16 = vpop.xlane.xlu0 %440  ;;  %v995_v39 = vmul.f32 %v2368_v61, %v983_v36 }
 0x162   : > { %v1853_v41 = vpop.eup %1852  ;;  %v974_v43 = vadd.f32 1e-05, %v958_v54  ;;  %v2404_v30 = vmul.f32 0.03125, %v438_v22 }
 0x163   : > { %v1855_v17 = vpop.eup %1854  ;;  %v1007_v48 = vadd.f32 %v2375_v33, %v995_v39  ;;  %v984_v29 = vmul.f32 %v1853_v41, %v960_v37  ;;  %v506_v37 = vmul.f32 %v2397_v28, %v2397_v28  ;;  %v2411_v39 = vmul.f32 0.03125, %v441_v16 }
 0x164   : > { %1864 = vrsqrt.f32 %v974_v43  ;;  %v985_v53 = vmul.f32 %v1855_v17, %v961_v21  ;;  %v507_v17 = vmul.f32 %v2404_v30, %v2404_v30 }
 0x165   : > { %v444_v31 = vpop.xlane.xlu1 %443  ;;  %v447_v32 = vpop.xlane.xlu0 %446  ;;  %v1015_v58 = vmax.f32 %v1007_v48, 0.0  ;;  %v996_v52 = vmul.f32 %v2368_v61, %v984_v29 }
 0x166   : > { %v1857_v57 = vpop.eup %1856  ;;  %v997_v26 = vmul.f32 %v2368_v61, %v985_v53  ;;  %v2418_v21 = vmul.f32 0.03125, %v444_v31  ;;  %v2420_v29 = vmul.f32 0.03125, %v447_v32 }
 0x167   : > { %v1859_v59 = vpop.eup %1858  ;;  %1705 = vmatprep.mubr.msk.f32.mxu1 %vm432_vm0, %v1015_v58  ;;  %v1008_v42 = vadd.f32 %v2375_v33, %v996_v52  ;;  %v986_v44 = vmul.f32 %v1857_v57, %v962_v15  ;;  %v508_v57 = vmul.f32 %v2411_v39, %v2411_v39 }
 0x168   : > { %v1009_v2 = vadd.f32 %v2375_v33, %v997_v26  ;;  %v987_v8 = vmul.f32 %v1859_v59, %v963_v40  ;;  %v509_v26 = vmul.f32 %v2418_v21, %v2418_v21 }
 0x169   : > { %v450_v20 = vpop.xlane.xlu1 %449  ;;  %v453_v47 = vpop.xlane.xlu0 %452  ;;  %v1016_v0 = vmax.f32 %v1008_v42, 0.0  ;;  %v998_v3 = vmul.f32 %v2368_v61, %v986_v44 }
 0x16a   : > { %v1861_v10 = vpop.eup %1860  ;;  %v1017_v25 = vmax.f32 %v1009_v2, 0.0  ;;  %v999_v45 = vmul.f32 %v2368_v61, %v987_v8  ;;  %v2435_v2 = vmul.f32 0.03125, %v453_v47 }
 0x16b   : > { %v1863_v24 = vpop.eup %1862  ;;  %1706 = vmatmul.mubr.msk.f32.vlgmr.msra.gmra.mrb[0].mxu1 %vm432_vm0, %v1016_v0  ;;  %v1010_v63 = vadd.f32 %v2375_v33, %v998_v3  ;;  %v988_v4 = vmul.f32 %v1861_v10, %v964_v49  ;;  %v2433_v0 = vmul.f32 0.03125, %v450_v20 }
 0x16c   : > { %1708 = vmatprep.mubr.msk.f32.mxu1 %vm432_vm0, %v1017_v25  ;;  %v1011_v1 = vadd.f32 %v2375_v33, %v999_v45  ;;  %v989_v36 = vmul.f32 %v1863_v24, %v965_v56  ;;  %v512_v47 = vmul.f32 %v2435_v2, %v2435_v2 }
 0x16d   : > { %v456_v34 = vpop.xlane.xlu1 %455  ;;  %v476_v6 = vpop.xlane.xlu0 %475  ;;  %v1018_v46 = vmax.f32 %v1010_v63, 0.0  ;;  %v1000_v35 = vmul.f32 %v2368_v61, %v988_v4  ;;  %v511_v20 = vmul.f32 %v2433_v0, %v2433_v0 }
 0x16e   : > { %v1865_v54 = vpop.eup %1864  ;;  %v498_v41 = vmul.f32 0.03125, %v476_v6  ;;  %v1019_v19 = vmax.f32 %v1011_v1, 0.0  ;;  %v1001_v22 = vmul.f32 %v2368_v61, %v989_v36  ;;  %v2443_v4 = vmul.f32 0.03125, %v456_v34 }
 0x16f   : > { %1709 = vmatmul.mubr.msk.f32.gmra.mrb[2].mxu1 %vm432_vm0, %v1018_v46  ;;  %v1012_v38 = vadd.f32 %v2375_v33, %v1000_v35  ;;  %v990_v43 = vmul.f32 %v1865_v54, %v966_v18  ;;  %v557_v34 = vrot.slane %v2201_v7, %v556_v55 }
 0x170   : > { %v514_v48 = vsub.f32 %v498_v41, %v506_v37  ;;  %1711 = vmatprep.mubr.msk.f32.mxu1 %vm432_vm0, %v1019_v19  ;;  %v1013_v52 = vadd.f32 %v2375_v33, %v1001_v22  ;;  %v522_v41 = vsub.f32 %v2241_v50, %v2397_v28  ;;  %v513_v22 = vmul.f32 %v2443_v4, %v2443_v4 }
 0x171   : > { %v479_v16 = vpop.xlane.xlu1 %478  ;;  %v482_v15 = vpop.xlane.xlu0 %481  ;;  %v1020_v58 = vmax.f32 %v1012_v38, 0.0  ;;  %v1002_v53 = vmul.f32 %v2368_v61, %v990_v43  ;;  %v510_v61 = vmul.f32 %v2420_v29, %v2420_v29  ;;  %v523_v28 = vsub.f32 %v2253_v60, %v2404_v30 }
 0x172   : > { %v530_v59 = vadd.f32 1e-05, %v514_v48  ;;  %v499_v40 = vmul.f32 0.03125, %v479_v16  ;;  %v500_v42 = vmul.f32 0.03125, %v482_v15  ;;  %v1021_v31 = vmax.f32 %v1013_v52, 0.0 }
 0x173   : > { %1712 = vmatmul.mubr.msk.f32.gmra.mrb[4].mxu1 %vm432_vm0, %v1020_v58  ;;  %v1014_v32 = vadd.f32 %v2375_v33, %v1002_v53  ;;  %v569_v15 = vrot.slane %v2201_v7, %v568_v5  ;;  %v524_v52 = vsub.f32 %v2256_v62, %v2411_v39  ;;  %v525_v5 = vsub.f32 %v2268_v51, %v2418_v21 }
 0x174   : > { %1866 = vrsqrt.f32 %v530_v59  ;;  %v515_v44 = vsub.f32 %v499_v40, %v507_v17  ;;  %v516_v49 = vsub.f32 %v500_v42, %v508_v57  ;;  %1714 = vmatprep.mubr.msk.f32.mxu1 %vm432_vm0, %v1021_v31  ;;  %v526_v60 = vsub.f32 %v2266_v9, %v2420_v29 }
 0x175   : > { %v485_v3 = vpop.xlane.xlu1 %484  ;;  %v488_v8 = vpop.xlane.xlu0 %487  ;;  %v1022_v10 = vmax.f32 %v1014_v32, 0.0  ;;  %v528_v21 = vsub.f32 %v2276_v27, %v2435_v2 }
 0x176   : > { %v531_v56 = vadd.f32 1e-05, %v515_v44  ;;  %v532_v33 = vadd.f32 1e-05, %v516_v49  ;;  %v501_v24 = vmul.f32 0.03125, %v485_v3  ;;  %v502_v25 = vmul.f32 0.03125, %v488_v8 }
 0x177   : > { %1715 = vmatmul.mubr.msk.f32.gmra.mrb[6].mxu1 %vm432_vm0, %v1022_v10  ;;  %v527_v3 = vsub.f32 %v2278_v13, %v2433_v0  ;;  %v529_v13 = vsub.f32 %v2286_v23, %v2443_v4  ;;  %v588_v4 = vsub.s32 4, %v2090_v11 }
 0x178   : > { %1868 = vrsqrt.f32 %v531_v56  ;;  %v517_v63 = vsub.f32 %v501_v24, %v509_v26  ;;  %v518_v45 = vsub.f32 %v502_v25, %v510_v61 }
 0x179   : > { %1870 = vrsqrt.f32 %v532_v33  ;;  %v491_v18 = vpop.xlane.xlu1 %490  ;;  %v494_v6 = vpop.xlane.xlu0 %493 }
 0x17a   : > { %v533_v46 = vadd.f32 1e-05, %v517_v63  ;;  %v534_v1 = vadd.f32 1e-05, %v518_v45  ;;  %v503_v35 = vmul.f32 0.03125, %v491_v18  ;;  %v504_v36 = vmul.f32 0.03125, %v494_v6 }
 0x17c   : > { %1872 = vrsqrt.f32 %v533_v46  ;;  %v519_v54 = vsub.f32 %v503_v35, %v511_v20  ;;  %v520_v37 = vsub.f32 %v504_v36, %v512_v47 }
 0x17d   : > { %1874 = vrsqrt.f32 %v534_v1  ;;  %v497_v19 = vpop.xlane.xlu1 %496 }
 0x17e   : > { %v1867_v38 = vpop.eup %1866  ;;  %v535_v43 = vadd.f32 1e-05, %v519_v54  ;;  %v536_v17 = vadd.f32 1e-05, %v520_v37  ;;  %v505_v48 = vmul.f32 0.03125, %v497_v19  ;;  %v1026_v54 = vrot.slane %v2105_v14, %v588_v4 }
 0x17f   : > { %v546_v16 = vmul.f32 %v1867_v38, %v522_v41 }
 0x180   : > { %1876 = vrsqrt.f32 %v535_v43  ;;  %v521_v50 = vsub.f32 %v505_v48, %v513_v22 }
 0x181   : > { %1878 = vrsqrt.f32 %v536_v17  ;;  %v558_v58 = vmul.f32 %v557_v34, %v546_v16 }
 0x182   : > { %v1869_v55 = vpop.eup %1868  ;;  %v537_v53 = vadd.f32 1e-05, %v521_v50 }
 0x183   : > { %v1871_v57 = vpop.eup %1870  ;;  %v570_v59 = vadd.f32 %v569_v15, %v558_v58  ;;  %v547_v40 = vmul.f32 %v1869_v55, %v523_v28 }
 0x184   : > { %1880 = vrsqrt.f32 %v537_v53  ;;  %v548_v42 = vmul.f32 %v1871_v57, %v524_v52 }
 0x185   : > { %v578_v31 = vmax.f32 %v570_v59, 0.0  ;;  %v559_v32 = vmul.f32 %v557_v34, %v547_v40 }
 0x186   : > { %v1873_v26 = vpop.eup %1872  ;;  %v560_v30 = vmul.f32 %v557_v34, %v548_v42 }
 0x187   : > { %v1875_v44 = vpop.eup %1874  ;;  %1685 = vmatprep.mubr.msk.f32.mxu0 %vm432_vm0, %v578_v31  ;;  %v571_v62 = vadd.f32 %v569_v15, %v559_v32  ;;  %v549_v39 = vmul.f32 %v1873_v26, %v525_v5 }
 0x188   : > { %v572_v49 = vadd.f32 %v569_v15, %v560_v30  ;;  %v550_v61 = vmul.f32 %v1875_v44, %v526_v60 }
 0x189   : > { %v579_v8 = vmax.f32 %v571_v62, 0.0  ;;  %v561_v10 = vmul.f32 %v557_v34, %v549_v39 }
 0x18a   : > { %v1877_v51 = vpop.eup %1876  ;;  %v580_v56 = vmax.f32 %v572_v49, 0.0  ;;  %v562_v33 = vmul.f32 %v557_v34, %v550_v61 }
 0x18b   : > { %v1879_v9 = vpop.eup %1878  ;;  %1686 = vmatmul.mubr.msk.f32.vlgmr.msra.gmra.mrb[0].mxu0 %vm432_vm0, %v579_v8  ;;  %v573_v29 = vadd.f32 %v569_v15, %v561_v10  ;;  %v551_v24 = vmul.f32 %v1877_v51, %v527_v3  ;;  %v589_v8 = vrot.slane %v2201_v7, %v588_v4 }
 0x18c   : > { %1688 = vmatprep.mubr.msk.f32.mxu0 %vm432_vm0, %v580_v56  ;;  %v574_v25 = vadd.f32 %v569_v15, %v562_v33  ;;  %v552_v63 = vmul.f32 %v1879_v9, %v528_v21 }
 0x18d   : > { %v581_v0 = vmax.f32 %v573_v29, 0.0  ;;  %v563_v45 = vmul.f32 %v557_v34, %v551_v24 }
 0x18e   : > { %v1881_v20 = vpop.eup %1880  ;;  %v582_v47 = vmax.f32 %v574_v25, 0.0  ;;  %v564_v18 = vmul.f32 %v557_v34, %v552_v63 }
 0x18f   : > { %1689 = vmatmul.mubr.msk.f32.gmra.mrb[2].mxu0 %vm432_vm0, %v581_v0  ;;  %v575_v27 = vadd.f32 %v569_v15, %v563_v45  ;;  %v553_v2 = vmul.f32 %v1881_v20, %v529_v13 }
 0x190   : > { %1691 = vmatprep.mubr.msk.f32.mxu0 %vm432_vm0, %v582_v47  ;;  %v576_v6 = vadd.f32 %v569_v15, %v564_v18 }
 0x191   : > { %v583_v46 = vmax.f32 %v575_v27, 0.0  ;;  %v565_v1 = vmul.f32 %v557_v34, %v553_v2 }
 0x192   : > { %v584_v35 = vmax.f32 %v576_v6, 0.0 }
 0x193   : > { %1692 = vmatmul.mubr.msk.f32.gmra.mrb[4].mxu0 %vm432_vm0, %v583_v46  ;;  %v577_v36 = vadd.f32 %v569_v15, %v565_v1 }
 0x194   : > { %1694 = vmatprep.mubr.msk.f32.mxu0 %vm432_vm0, %v584_v35 }
 0x195   : > { %v585_v23 = vmax.f32 %v577_v36, 0.0 }
 0x197   : > { %1695 = vmatmul.mubr.msk.f32.gmra.mrb[6].mxu0 %vm432_vm0, %v585_v23 }
 0x23e   : > { %v1707_v37 = vpop.f32.mrb[0].mxu1 }
 0x23f   : > { %v2479_v41 = vadd.f32 %v1707_v37, %v1026_v54  ;;  %v1117_v19 = vpop.f32.mrb[1].mxu1 }
 0x240   : > { %v2481_v38 = vadd.f32 %v1117_v19, %v1026_v54 }
 0x241   : > { %v1159_v34 = vsel %vm432_vm0, %v2479_v41, 0.0  ;;  %v1189_v48 = vmul.f32 %v2479_v41, %v2479_v41 }
 0x242   : > { %1160 = vadd.xlane.f32.xlu0 %v1159_v34  ;;  %v1710_v22 = vpop.f32.mrb[2].mxu1  ;;  %v1156_v17 = vsel %vm432_vm0, %v2481_v38, 0.0  ;;  %v1188_v55 = vmul.f32 %v2481_v38, %v2481_v38 }
 0x243   : > { %v1127_v43 = vpop.f32.mrb[3].mxu1  ;;  %v1199_v28 = vsel %vm432_vm0, %v1189_v48, 0.0  ;;  %v2498_v57 = vadd.f32 %v1710_v22, %v1026_v54 }
 0x244   : > { %v1196_v59 = vsel %vm432_vm0, %v1188_v55, 0.0  ;;  %v2505_v5 = vadd.f32 %v1127_v43, %v1026_v54 }
 0x245   : > { %v1165_v31 = vsel %vm432_vm0, %v2498_v57, 0.0  ;;  %v1191_v3 = vmul.f32 %v2498_v57, %v2498_v57 }
 0x246   : > { %1157 = vadd.xlane.f32.xlu0 %v1156_v17  ;;  %v1713_v14 = vpop.f32.mrb[4].mxu1  ;;  %v1162_v30 = vsel %vm432_vm0, %v2505_v5, 0.0  ;;  %v1190_v62 = vmul.f32 %v2505_v5, %v2505_v5 }
 0x247   : > { %v2489_v16 = vadd.f32 %v1713_v14, %v1026_v54  ;;  %v1137_v15 = vpop.f32.mrb[5].mxu1  ;;  %v1205_v10 = vsel %vm432_vm0, %v1191_v3, 0.0  ;;  %v267_v3 = vld [vmem:[%s2833_s3 + $0x20] sm:$0xff] }
 0x248   : > { %v2491_v50 = vadd.f32 %v1137_v15, %v1026_v54  ;;  %v1202_v49 = vsel %vm432_vm0, %v1190_v62, 0.0 }
 0x249   : > { %v1171_v58 = vsel %vm432_vm0, %v2489_v16, 0.0  ;;  %v1193_v42 = vmul.f32 %v2489_v16, %v2489_v16 }
 0x24a   : > { %1200 = vadd.xlane.f32.xlu0 %v1199_v28  ;;  %1172 = vadd.xlane.f32.xlu1 %v1171_v58  ;;  %v1716_v52 = vpop.f32.mrb[6].mxu1  ;;  %v1168_v40 = vsel %vm432_vm0, %v2491_v50, 0.0  ;;  %v1192_v26 = vmul.f32 %v2491_v50, %v2491_v50 }
 0x24b   : > { %v1147_v53 = vpop.f32.mrb[7].mxu1  ;;  %v1211_v32 = vsel %vm432_vm0, %v1193_v42, 0.0  ;;  %v2512_v60 = vadd.f32 %v1716_v52, %v1026_v54 }
 0x24c   : > { %v1208_v44 = vsel %vm432_vm0, %v1192_v26, 0.0  ;;  %v2519_v39 = vadd.f32 %v1147_v53, %v1026_v54  ;;  %v263_v26 = vld [vmem:[%s2833_s3] sm:$0xff] }
 0x24d   : > { %v1177_v61 = vsel %vm432_vm0, %v2512_v60, 0.0  ;;  %v1195_v24 = vmul.f32 %v2512_v60, %v2512_v60 }
 0x24e   : > { %1197 = vadd.xlane.f32.xlu0 %v1196_v59  ;;  %1169 = vadd.xlane.f32.xlu1 %v1168_v40  ;;  %v1174_v51 = vsel %vm432_vm0, %v2519_v39, 0.0  ;;  %v1194_v21 = vmul.f32 %v2519_v39, %v2519_v39 }
 0x24f   : > { %v1217_v0 = vsel %vm432_vm0, %v1195_v24, 0.0 }
 0x250   : > { %v1214_v29 = vsel %vm432_vm0, %v1194_v21, 0.0 }
 0x252   : > { %1166 = vadd.xlane.f32.xlu0 %v1165_v31  ;;  %1212 = vadd.xlane.f32.xlu1 %v1211_v32 }
 0x256   : > { %1163 = vadd.xlane.f32.xlu0 %v1162_v30  ;;  %1209 = vadd.xlane.f32.xlu1 %v1208_v44  ;;  %v264_v30 = vld [vmem:[%s2833_s3 + $0x8] sm:$0xff]  ;;  %v265_v44 = vld [vmem:[%s2833_s3 + $0x10] sm:$0xff] }
 0x257   : > { %v1761_v62 = vpack.c.bf16 %v264_v30, %v263_v26  ;;  %v1914_v30 = vld [vmem:[%s2832_s2 + $0x28] sm:$0xff] }
 0x259   : > { %1762 = vmatprep.subr.bf16.mxu0 %v1761_v62  ;;  %1777 = vmatprep.subr.bf16.mxu1 %v1761_v62 }
 0x25a   : > { %1203 = vadd.xlane.f32.xlu0 %v1202_v49  ;;  %1178 = vadd.xlane.f32.xlu1 %v1177_v61  ;;  %v266_v49 = vld [vmem:[%s2833_s3 + $0x18] sm:$0xff] }
 0x25b   : > { %v1765_v61 = vpack.c.bf16 %v266_v49, %v265_v44  ;;  %1764 = vmatpush3.bf16.msra.mxu0 %v1761_v62  ;;  %1781 = vmatpush3.bf16.msra.mxu1 %v1761_v62 }
 0x25d   : > { %1766 = vmatprep.subr.bf16.mxu0 %v1765_v61  ;;  %1778 = vmatprep.subr.bf16.mxu1 %v1765_v61 }
 0x25e   : > { %1206 = vadd.xlane.f32.xlu0 %v1205_v10  ;;  %1175 = vadd.xlane.f32.xlu1 %v1174_v51  ;;  %v1687_v56 = vpop.f32.mrb[0].mxu0 }
 0x25f   : > { %v680_v33 = vpop.f32.mrb[1].mxu0  ;;  %v2537_v7 = vadd.f32 %v1687_v56, %v589_v8  ;;  %1768 = vmatpush3.bf16.msra.mxu0 %v1765_v61  ;;  %1782 = vmatpush3.bf16.msra.mxu1 %v1765_v61 }
 0x260   : > { %v2532_v9 = vadd.f32 %v680_v33, %v589_v8 }
 0x261   : > { %v722_v20 = vsel %vm432_vm0, %v2537_v7, 0.0  ;;  %v752_v35 = vmul.f32 %v2537_v7, %v2537_v7 }
 0x262   : > { %1215 = vadd.xlane.f32.xlu1 %v1214_v29  ;;  %v1690_v25 = vpop.f32.mrb[2].mxu0  ;;  %v719_v63 = vsel %vm432_vm0, %v2532_v9, 0.0  ;;  %v751_v47 = vmul.f32 %v2532_v9, %v2532_v9 }
 0x263   : > { %720 = vadd.xlane.f32.xlu0 %v719_v63  ;;  %v690_v13 = vpop.f32.mrb[3].mxu0  ;;  %v762_v4 = vsel %vm432_vm0, %v752_v35, 0.0  ;;  %v2562_v19 = vadd.f32 %v1690_v25, %v589_v8 }
 0x264   : > { %v759_v46 = vsel %vm432_vm0, %v751_v47, 0.0  ;;  %v2555_v23 = vadd.f32 %v690_v13, %v589_v8 }
 0x265   : > { %v728_v48 = vsel %vm432_vm0, %v2562_v19, 0.0  ;;  %v754_v52 = vmul.f32 %v2562_v19, %v2562_v19 }
 0x266   : > { %1218 = vadd.xlane.f32.xlu1 %v1217_v0  ;;  %v1693_v45 = vpop.f32.mrb[4].mxu0  ;;  %v725_v34 = vsel %vm432_vm0, %v2555_v23, 0.0  ;;  %v753_v15 = vmul.f32 %v2555_v23, %v2555_v23 }
 0x267   : > { %723 = vadd.xlane.f32.xlu0 %v722_v20  ;;  %v700_v18 = vpop.f32.mrb[5].mxu0  ;;  %v2548_v2 = vadd.f32 %v1693_v45, %v589_v8  ;;  %v768_v53 = vsel %vm432_vm0, %v754_v52, 0.0  ;;  %v269_v52 = vld [vmem:[%s2833_s3 + $0x30] sm:$0xff] }
 0x268   : > { %v2546_v27 = vadd.f32 %v700_v18, %v589_v8  ;;  %v765_v58 = vsel %vm432_vm0, %v753_v15, 0.0 }
 0x269   : > { %v734_v54 = vsel %vm432_vm0, %v2548_v2, 0.0  ;;  %v756_v43 = vmul.f32 %v2548_v2, %v2548_v2 }
 0x26a   : > { %v1696_v6 = vpop.f32.mrb[6].mxu0  ;;  %v731_v1 = vsel %vm432_vm0, %v2546_v27, 0.0  ;;  %v755_v37 = vmul.f32 %v2546_v27, %v2546_v27 }
 0x26b   : > { %760 = vadd.xlane.f32.xlu0 %v759_v46  ;;  %732 = vadd.xlane.f32.xlu1 %v731_v1  ;;  %v710_v36 = vpop.f32.mrb[7].mxu0  ;;  %v774_v14 = vsel %vm432_vm0, %v756_v43, 0.0  ;;  %v2576_v28 = vadd.f32 %v1696_v6, %v589_v8 }
 0x26c   : > { %v771_v22 = vsel %vm432_vm0, %v755_v37, 0.0  ;;  %v2569_v17 = vadd.f32 %v710_v36, %v589_v8  ;;  %v268_v8 = vld [vmem:[%s2833_s3 + $0x28] sm:$0xff] }
 0x26d   : > { %v740_v59 = vsel %vm432_vm0, %v2576_v28, 0.0  ;;  %v758_v40 = vmul.f32 %v2576_v28, %v2576_v28  ;;  %v1769_v10 = vpack.c.bf16 %v268_v8, %v267_v3 }
 0x26e   : > { %v737_v55 = vsel %vm432_vm0, %v2569_v17, 0.0  ;;  %v757_v31 = vmul.f32 %v2569_v17, %v2569_v17 }
 0x26f   : > { %763 = vadd.xlane.f32.xlu0 %v762_v4  ;;  %735 = vadd.xlane.f32.xlu1 %v734_v54  ;;  %v780_v42 = vsel %vm432_vm0, %v758_v40, 0.0 }
 0x270   : > { %v777_v32 = vsel %vm432_vm0, %v757_v31, 0.0  ;;  %1770 = vmatprep.subr.bf16.mxu0 %v1769_v10  ;;  %1779 = vmatprep.subr.bf16.mxu1 %v1769_v10 }
 0x271   : > { %1772 = vmatpush3.bf16.msra.mxu0 %v1769_v10  ;;  %1783 = vmatpush3.bf16.msra.mxu1 %v1769_v10 }
 0x273   : > { %726 = vadd.xlane.f32.xlu0 %v725_v34  ;;  %772 = vadd.xlane.f32.xlu1 %v771_v22 }
 0x277   : > { %729 = vadd.xlane.f32.xlu0 %v728_v48  ;;  %775 = vadd.xlane.f32.xlu1 %v774_v14  ;;  %v841_v48 = vsub.s32 5, %v2090_v11 }
 0x279   : > { %v2634_v44 = vrot.slane %v1914_v30, %v841_v48 }
 0x27b   : > { %766 = vadd.xlane.f32.xlu0 %v765_v58  ;;  %738 = vadd.xlane.f32.xlu1 %v737_v55 }
 0x27f   : > { %769 = vadd.xlane.f32.xlu0 %v768_v53  ;;  %741 = vadd.xlane.f32.xlu1 %v740_v59  ;;  %v270_v53 = vld [vmem:[%s2833_s3 + $0x38] sm:$0xff]  ;;  %v853_v59 = vsub.s32 6, %v2090_v11 }
 0x280   : > { %v1773_v40 = vpack.c.bf16 %v270_v53, %v269_v52 }
 0x281   : > { %v2642_v10 = vrot.slane %v1914_v30, %v853_v59 }
 0x282   : > { %1774 = vmatprep.subr.bf16.mxu0 %v1773_v40  ;;  %1780 = vmatprep.subr.bf16.mxu1 %v1773_v40 }
 0x283   : > { %781 = vadd.xlane.f32.xlu1 %v780_v42  ;;  %1776 = vmatpush3.bf16.msra.mxu0 %v1773_v40 }
 0x284   : > { %1784 = vmatpush3.bf16.msra.mxu1 %v1773_v40 }
 0x287   : > { %778 = vadd.xlane.f32.xlu1 %v777_v32 }
 0x2cf   : > { %v1161_v51 = vpop.xlane.xlu0 %1160 }
 0x2d0   : > { %v1181_v56 = vmul.f32 0.03125, %v1161_v51 }
 0x2d2   : > { %v1229_v24 = vmul.f32 %v1181_v56, %v1181_v56  ;;  %v1245_v31 = vsub.f32 %v2479_v41, %v1181_v56 }
 0x2d3   : > { %v1158_v21 = vpop.xlane.xlu0 %1157 }
 0x2d4   : > { %v1180_v25 = vmul.f32 0.03125, %v1158_v21 }
 0x2d6   : > { %v1228_v20 = vmul.f32 %v1180_v25, %v1180_v25  ;;  %v1244_v21 = vsub.f32 %v2481_v38, %v1180_v25 }
 0x2d7   : > { %v1173_v33 = vpop.xlane.xlu1 %1172  ;;  %v1201_v29 = vpop.xlane.xlu0 %1200 }
 0x2d8   : > { %v1221_v63 = vmul.f32 0.03125, %v1201_v29  ;;  %v2610_v47 = vmul.f32 0.03125, %v1173_v33 }
 0x2da   : > { %v1237_v13 = vsub.f32 %v1221_v63, %v1229_v24  ;;  %v1233_v36 = vmul.f32 %v2610_v47, %v2610_v47  ;;  %v1249_v38 = vsub.f32 %v2489_v16, %v2610_v47 }
 0x2db   : > { %v1170_v0 = vpop.xlane.xlu1 %1169  ;;  %v1198_v45 = vpop.xlane.xlu0 %1197 }
 0x2dc   : > { %v1253_v18 = vadd.f32 1e-05, %v1237_v13  ;;  %v1220_v6 = vmul.f32 0.03125, %v1198_v45  ;;  %v2614_v4 = vmul.f32 0.03125, %v1170_v0 }
 0x2de   : > { %1882 = vrsqrt.f32 %v1253_v18  ;;  %v1236_v46 = vsub.f32 %v1220_v6, %v1228_v20  ;;  %v1232_v14 = vmul.f32 %v2614_v4, %v2614_v4  ;;  %v1248_v47 = vsub.f32 %v2491_v50, %v2614_v4 }
 0x2df   : > { %v1213_v1 = vpop.xlane.xlu1 %1212  ;;  %v1167_v35 = vpop.xlane.xlu0 %1166 }
 0x2e0   : > { %v1252_v54 = vadd.f32 1e-05, %v1236_v46  ;;  %v1225_v37 = vmul.f32 0.03125, %v1213_v1  ;;  %v2636_v49 = vmul.f32 0.03125, %v1167_v35 }
 0x2e2   : > { %1884 = vrsqrt.f32 %v1252_v54  ;;  %v1241_v34 = vsub.f32 %v1225_v37, %v1233_v36  ;;  %v1231_v63 = vmul.f32 %v2636_v49, %v2636_v49 }
 0x2e3   : > { %v1210_v22 = vpop.xlane.xlu1 %1209  ;;  %v1164_v43 = vpop.xlane.xlu0 %1163 }
 0x2e4   : > { %v1257_v15 = vadd.f32 1e-05, %v1241_v34  ;;  %v1224_v58 = vmul.f32 0.03125, %v1210_v22  ;;  %v2619_v55 = vmul.f32 0.03125, %v1164_v43 }
 0x2e6   : > { %1886 = vrsqrt.f32 %v1257_v15  ;;  %v1240_v42 = vsub.f32 %v1224_v58, %v1232_v14  ;;  %v1230_v3 = vmul.f32 %v2619_v55, %v2619_v55  ;;  %v1246_v4 = vsub.f32 %v2505_v5, %v2619_v55 }
 0x2e7   : > { %v1179_v32 = vpop.xlane.xlu1 %1178  ;;  %v1204_v26 = vpop.xlane.xlu0 %1203  ;;  %v1247_v5 = vsub.f32 %v2498_v57, %v2636_v49 }
 0x2e8   : > { %v1883_v62 = vpop.eup %1882  ;;  %v1256_v61 = vadd.f32 1e-05, %v1240_v42  ;;  %v1222_v41 = vmul.f32 0.03125, %v1204_v26  ;;  %v2654_v36 = vmul.f32 0.03125, %v1179_v32 }
 0x2e9   : > { %v1269_v8 = vmul.f32 %v1883_v62, %v1245_v31 }
 0x2ea   : > { %1888 = vrsqrt.f32 %v1256_v61  ;;  %v1238_v51 = vsub.f32 %v1222_v41, %v1230_v3  ;;  %v1235_v40 = vmul.f32 %v2654_v36, %v2654_v36 }
 0x2eb   : > { %v1176_v56 = vpop.xlane.xlu1 %1175  ;;  %v1207_v33 = vpop.xlane.xlu0 %1206  ;;  %v1281_v29 = vmul.f32 %v2634_v44, %v1269_v8 }
 0x2ec   : > { %v1885_v24 = vpop.eup %1884  ;;  %v1254_v13 = vadd.f32 1e-05, %v1238_v51  ;;  %v2648_v0 = vmul.f32 0.03125, %v1176_v56  ;;  %v1223_v45 = vmul.f32 0.03125, %v1207_v33 }
 0x2ed   : > { %v1293_v20 = vadd.f32 %v2642_v10, %v1281_v29  ;;  %v1268_v18 = vmul.f32 %v1885_v24, %v1244_v21 }
 0x2ee   : > { %1890 = vrsqrt.f32 %v1254_v13  ;;  %v1239_v6 = vsub.f32 %v1223_v45, %v1231_v63  ;;  %v1234_v54 = vmul.f32 %v2648_v0, %v2648_v0  ;;  %v1250_v57 = vsub.f32 %v2519_v39, %v2648_v0 }
 0x2ef   : > { %v1216_v25 = vpop.xlane.xlu1 %1215  ;;  %v1301_v46 = vmax.f32 %v1293_v20, 0.0  ;;  %v1280_v1 = vmul.f32 %v2634_v44, %v1268_v18  ;;  %v1251_v0 = vsub.f32 %v2512_v60, %v2654_v36 }
 0x2f0   : > { %v1887_v35 = vpop.eup %1886  ;;  %v1255_v37 = vadd.f32 1e-05, %v1239_v6  ;;  %v1226_v34 = vmul.f32 0.03125, %v1216_v25  ;;  %v721_v22 = vpop.xlane.xlu0 %720 }
 0x2f1   : > { %1318 = vrot.lane.b32.xlu1 %v1301_v46, %s1998_s26  ;;  %v1292_v43 = vadd.f32 %v2642_v10, %v1280_v1  ;;  %v1273_v14 = vmul.f32 %v1887_v35, %v1249_v38  ;;  %v2665_v26 = vmul.f32 0.03125, %v721_v22 }
 0x2f2   : > { %1892 = vrsqrt.f32 %v1255_v37  ;;  %v1242_v16 = vsub.f32 %v1226_v34, %v1234_v54 }
 0x2f3   : > { %v1219_v15 = vpop.xlane.xlu1 %1218  ;;  %v1300_v58 = vmax.f32 %v1292_v43, 0.0  ;;  %v1285_v52 = vmul.f32 %v2634_v44, %v1273_v14  ;;  %v791_v33 = vmul.f32 %v2665_v26, %v2665_v26 }
 0x2f4   : > { %v1889_v53 = vpop.eup %1888  ;;  %v1258_v42 = vadd.f32 1e-05, %v1242_v16  ;;  %v1227_v31 = vmul.f32 0.03125, %v1219_v15  ;;  %v724_v32 = vpop.xlane.xlu0 %723 }
 0x2f5   : > { %1316 = vrot.lane.b32.xlu0 %v1300_v58, %s1998_s26  ;;  %v1297_v30 = vadd.f32 %v2642_v10, %v1285_v52  ;;  %v1272_v62 = vmul.f32 %v1889_v53, %v1248_v47  ;;  %v2672_v51 = vmul.f32 0.03125, %v724_v32 }
 0x2f6   : > { %1894 = vrsqrt.f32 %v1258_v42  ;;  %v1243_v50 = vsub.f32 %v1227_v31, %v1235_v40 }
 0x2f7   : > { %v1305_v61 = vmax.f32 %v1297_v30, 0.0  ;;  %v1284_v3 = vmul.f32 %v2634_v44, %v1272_v62  ;;  %v792_v20 = vmul.f32 %v2672_v51, %v2672_v51 }
 0x2f8   : > { %v1891_v41 = vpop.eup %1890  ;;  %v1259_v8 = vadd.f32 1e-05, %v1243_v50  ;;  %v733_v21 = vpop.xlane.xlu1 %732 }
 0x2f9   : > { %v761_v56 = vpop.xlane.xlu0 %760  ;;  %1326 = vrot.lane.b32.xlu0 %v1305_v61, %s1998_s26  ;;  %v1296_v24 = vadd.f32 %v2642_v10, %v1284_v3  ;;  %v1270_v63 = vmul.f32 %v1891_v41, %v1246_v4  ;;  %v2683_v25 = vmul.f32 0.03125, %v733_v21  ;;  %v807_v41 = vsub.f32 %v2532_v9, %v2665_v26 }
 0x2fa   : > { %v783_v29 = vmul.f32 0.03125, %v761_v56  ;;  %1896 = vrsqrt.f32 %v1259_v8 }
 0x2fb   : > { %v1304_v13 = vmax.f32 %v1296_v24, 0.0  ;;  %v1282_v38 = vmul.f32 %v2634_v44, %v1270_v63  ;;  %v795_v47 = vmul.f32 %v2683_v25, %v2683_v25 }
 0x2fc   : > { %v799_v55 = vsub.f32 %v783_v29, %v791_v33  ;;  %v1893_v45 = vpop.eup %1892  ;;  %v736_v18 = vpop.xlane.xlu1 %735  ;;  %v1915_v29 = vld [vmem:[%s2832_s2] sm:$0xff] }
 0x2fd   : > { %v764_v6 = vpop.xlane.xlu0 %763  ;;  %1324 = vrot.lane.b32.xlu1 %v1304_v13, %s1998_s26  ;;  %v1271_v35 = vmul.f32 %v1893_v45, %v1247_v5  ;;  %v1294_v54 = vadd.f32 %v2642_v10, %v1282_v38  ;;  %v2689_v34 = vmul.f32 0.03125, %v736_v18  ;;  %v2713_v24 = vrot.slane %v1915_v29, %v841_v48 }
 0x2fe   : > { %v815_v46 = vadd.f32 1e-05, %v799_v55  ;;  %v784_v1 = vmul.f32 0.03125, %v764_v6  ;;  %v808_v48 = vsub.f32 %v2537_v7, %v2672_v51  ;;  %v811_v7 = vsub.f32 %v2546_v27, %v2683_v25 }
 0x2ff   : > { %v1302_v14 = vmax.f32 %v1294_v54, 0.0  ;;  %v1283_v16 = vmul.f32 %v2634_v44, %v1271_v35  ;;  %v796_v42 = vmul.f32 %v2689_v34, %v2689_v34 }
 0x300   : > { %1898 = vrsqrt.f32 %v815_v46  ;;  %v800_v49 = vsub.f32 %v784_v1, %v792_v20  ;;  %v1895_v37 = vpop.eup %1894  ;;  %v773_v22 = vpop.xlane.xlu1 %772 }
 0x301   : > { %v727_v43 = vpop.xlane.xlu0 %726  ;;  %v787_v58 = vmul.f32 0.03125, %v773_v22  ;;  %v1274_v52 = vmul.f32 %v1895_v37, %v1250_v57  ;;  %1320 = vrot.lane.b32.xlu1 %v1302_v14, %s1998_s26  ;;  %v1295_v39 = vadd.f32 %v2642_v10, %v1283_v16 }
 0x302   : > { %v816_v15 = vadd.f32 1e-05, %v800_v49  ;;  %v2701_v4 = vmul.f32 0.03125, %v727_v43 }
 0x303   : > { %v803_v53 = vsub.f32 %v787_v58, %v795_v47  ;;  %v1303_v30 = vmax.f32 %v1295_v39, 0.0  ;;  %v1286_v62 = vmul.f32 %v2634_v44, %v1274_v52  ;;  %v812_v39 = vsub.f32 %v2548_v2, %v2689_v34 }
 0x304   : > { %1900 = vrsqrt.f32 %v816_v15  ;;  %v1897_v40 = vpop.eup %1896  ;;  %v776_v31 = vpop.xlane.xlu1 %775  ;;  %v793_v5 = vmul.f32 %v2701_v4, %v2701_v4 }
 0x305   : > { %v730_v32 = vpop.xlane.xlu0 %729  ;;  %v819_v50 = vadd.f32 1e-05, %v803_v53  ;;  %v788_v61 = vmul.f32 0.03125, %v776_v31  ;;  %v1275_v3 = vmul.f32 %v1897_v40, %v1251_v0  ;;  %1322 = vrot.lane.b32.xlu1 %v1303_v30, %s1998_s26  ;;  %v1298_v60 = vadd.f32 %v2642_v10, %v1286_v62 }
 0x306   : > { %v746_v13 = vmul.f32 0.03125, %v730_v32  ;;  %v809_v62 = vsub.f32 %v2555_v23, %v2701_v4 }
 0x307   : > { %1902 = vrsqrt.f32 %v819_v50  ;;  %v804_v36 = vsub.f32 %v788_v61, %v796_v42  ;;  %v1306_v56 = vmax.f32 %v1298_v60, 0.0  ;;  %v1287_v33 = vmul.f32 %v2634_v44, %v1275_v3 }
 0x308   : > { %v739_v8 = vpop.xlane.xlu1 %738  ;;  %v2721_v44 = vrot.slane %v1915_v29, %v853_v59  ;;  %v794_v35 = vmul.f32 %v746_v13, %v746_v13  ;;  %v810_v60 = vsub.f32 %v2562_v19, %v746_v13 }
 0x309   : > { %v767_v21 = vpop.xlane.xlu0 %766  ;;  %v820_v55 = vadd.f32 1e-05, %v804_v36  ;;  %1328 = vrot.lane.b32.xlu0 %v1306_v56, %s1998_s26  ;;  %v1299_v26 = vadd.f32 %v2642_v10, %v1287_v33  ;;  %v749_v43 = vmul.f32 0.03125, %v739_v8 }
 0x30a   : > { %v1899_v63 = vpop.eup %1898  ;;  %v785_v9 = vmul.f32 0.03125, %v767_v21 }
 0x30b   : > { %v831_v45 = vmul.f32 %v1899_v63, %v807_v41  ;;  %1904 = vrsqrt.f32 %v820_v55  ;;  %v1307_v38 = vmax.f32 %v1299_v26, 0.0  ;;  %v797_v25 = vmul.f32 %v749_v43, %v749_v43 }
 0x30c   : > { %v801_v20 = vsub.f32 %v785_v9, %v793_v5  ;;  %v742_v18 = vpop.xlane.xlu1 %741  ;;  %v813_v63 = vsub.f32 %v2569_v17, %v749_v43 }
 0x30d   : > { %v770_v6 = vpop.xlane.xlu0 %769  ;;  %v843_v46 = vmul.f32 %v2713_v24, %v831_v45  ;;  %v750_v57 = vmul.f32 0.03125, %v742_v18  ;;  %1330 = vrot.lane.b32.xlu0 %v1307_v38, %s1998_s26  ;;  %s1922_s26 = scalar_lea.vmem %s1921_s24, 2048 }
 0x30e   : > { %v1901_v1 = vpop.eup %1900  ;;  %v817_v54 = vadd.f32 1e-05, %v801_v20  ;;  %v786_v10 = vmul.f32 0.03125, %v770_v6  ;;  %p1924_p2 = scmp.lt.s32.totalorder %s1922_s26, %s1916_s18 }
 0x30f   : > { %v832_v11 = vmul.f32 %v1901_v1, %v808_v48  ;;  %v855_v59 = vadd.f32 %v2721_v44, %v843_v46  ;;  %v798_v14 = vmul.f32 %v750_v57, %v750_v57  ;;  %v814_v56 = vsub.f32 %v2576_v28, %v750_v57 }
 0x310   : > { %1906 = vrsqrt.f32 %v817_v54  ;;  %v802_v49 = vsub.f32 %v786_v10, %v794_v35  ;;  %v782_v51 = vpop.xlane.xlu1 %781  ;;  %p1925_p3 = por %p1924_p2, %p1923_p1 }
 0x311   : > { %v844_v37 = vmul.f32 %v2713_v24, %v832_v11  ;;  %v1903_v22 = vpop.eup %1902  ;;  %v790_v47 = vmul.f32 0.03125, %v782_v51  ;;  %v863_v28 = vmax.f32 %v855_v59, 0.0 }
 0x312   : > { %v818_v16 = vadd.f32 1e-05, %v802_v49  ;;  %v835_v58 = vmul.f32 %v1903_v22, %v811_v7  ;;  %p1926_p5 = pnand %p1925_p3, %p1919_p0 }
 0x313   : > { %v856_v15 = vadd.f32 %v2721_v44, %v844_v37  ;;  %v806_v52 = vsub.f32 %v790_v47, %v798_v14  ;;  %v271_v14 = vld [vmem:[%s2833_s3 + $0x40] sm:$0xff] }
 0x314   : > { %1908 = vrsqrt.f32 %v818_v16  ;;  %v779_v0 = vpop.xlane.xlu1 %778  ;;  %v847_v53 = vmul.f32 %v2713_v24, %v835_v58  ;;  %v1351_v16 = vrot.slane %v271_v14, %v2094_v12 }
 0x315   : > { %v1905_v27 = vpop.eup %1904  ;;  %v822_v40 = vadd.f32 1e-05, %v806_v52  ;;  %v789_v42 = vmul.f32 0.03125, %v779_v0  ;;  %v864_v20 = vmax.f32 %v856_v15, 0.0 }
 0x316   : > { %v836_v31 = vmul.f32 %v1905_v27, %v812_v39  ;;  %v859_v32 = vadd.f32 %v2721_v44, %v847_v53 }
 0x317   : > { %1910 = vrsqrt.f32 %v822_v40  ;;  %v805_v30 = vsub.f32 %v789_v42, %v797_v25 }
 0x318   : > { %v848_v50 = vmul.f32 %v2713_v24, %v836_v31  ;;  %v867_v38 = vmax.f32 %v859_v32, 0.0 }
 0x319   : > { %v821_v3 = vadd.f32 1e-05, %v805_v30 }
 0x31a   : > { %v1907_v61 = vpop.eup %1906  ;;  %v860_v2 = vadd.f32 %v2721_v44, %v848_v50 }
 0x31b   : > { %v833_v34 = vmul.f32 %v1907_v61, %v809_v62  ;;  %1912 = vrsqrt.f32 %v821_v3 }
 0x31c   : > { %v868_v46 = vmax.f32 %v860_v2, 0.0 }
 0x31d   : > { %v845_v36 = vmul.f32 %v2713_v24, %v833_v34 }
 0x31e   : > { %v1909_v41 = vpop.eup %1908 }
 0x31f   : > { %v857_v8 = vadd.f32 %v2721_v44, %v845_v36  ;;  %v834_v21 = vmul.f32 %v1909_v41, %v810_v60 }
 0x321   : > { %v846_v23 = vmul.f32 %v2713_v24, %v834_v21  ;;  %v1911_v4 = vpop.eup %1910  ;;  %v865_v35 = vmax.f32 %v857_v8, 0.0 }
 0x322   : > { %v838_v29 = vmul.f32 %v1911_v4, %v814_v56 }
 0x323   : > { %v858_v33 = vadd.f32 %v2721_v44, %v846_v23 }
 0x324   : > { %v850_v5 = vmul.f32 %v2713_v24, %v838_v29 }
 0x325   : > { %v1913_v55 = vpop.eup %1912  ;;  %v866_v10 = vmax.f32 %v858_v33, 0.0 }
 0x326   : > { %v837_v19 = vmul.f32 %v1913_v55, %v813_v63  ;;  %v862_v13 = vadd.f32 %v2721_v44, %v850_v5 }
 0x328   : > { %v849_v9 = vmul.f32 %v2713_v24, %v837_v19  ;;  %v870_v37 = vmax.f32 %v862_v13, 0.0 }
 0x32a   : > { %v861_v26 = vadd.f32 %v2721_v44, %v849_v9 }
 0x32c   : > { %v869_v49 = vmax.f32 %v861_v26, 0.0 }
 0x363   : > { %v1319_v45 = vpop.permute.xlu1 %1318 }
 0x364   : > { %v1341_v6 = vsel %vm432_vm0, %v864_v20, %v1319_v45 }
 0x367   : > { %v1317_v48 = vpop.permute.xlu0 %1316 }
 0x368   : > { %v1340_v18 = vsel %vm432_vm0, %v863_v28, %v1317_v48 }
 0x369   : > { %1733 = vmatprep.mubr.msk.f32.mxu0 %vm1352_vm1, %v1340_v18 }
 0x36a   : > { %1734 = vmatmul.mubr.msk.f32.vlgmr.msra.gmra.mrb[8].mxu0 %vm1352_vm1, %v1341_v6 }
 0x36b   : > { %v1327_v17 = vpop.permute.xlu0 %1326 }
 0x36c   : > { %v1345_v44 = vsel %vm432_vm0, %v868_v46, %v1327_v17 }
 0x36f   : > { %v1325_v1 = vpop.permute.xlu1 %1324 }
 0x370   : > { %v1344_v24 = vsel %vm432_vm0, %v867_v38, %v1325_v1 }
 0x371   : > { %1739 = vmatprep.mubr.msk.f32.mxu1 %vm1352_vm1, %v1344_v24 }
 0x372   : > { %1740 = vmatmul.mubr.msk.f32.vlgmr.msra.gmra.mrb[8].mxu1 %vm1352_vm1, %v1345_v44 }
 0x373   : > { %v1321_v54 = vpop.permute.xlu1 %1320 }
 0x374   : > { %v1342_v57 = vsel %vm432_vm0, %v865_v35, %v1321_v54 }
 0x375   : > { %1736 = vmatprep.mubr.msk.f32.mxu0 %vm1352_vm1, %v1342_v57 }
 0x377   : > { %v1323_v11 = vpop.permute.xlu1 %1322 }
 0x378   : > { %v1343_v59 = vsel %vm432_vm0, %v866_v10, %v1323_v11 }
 0x379   : > { %1737 = vmatmul.mubr.msk.f32.gmra.mrb[10].mxu0 %vm1352_vm1, %v1343_v59 }
 0x37b   : > { %v1329_v7 = vpop.permute.xlu0 %1328 }
 0x37c   : > { %v1346_v51 = vsel %vm432_vm0, %v869_v49, %v1329_v7 }
 0x37d   : > { %1742 = vmatprep.mubr.msk.f32.mxu1 %vm1352_vm1, %v1346_v51 }
 0x37f   : > { %v1331_v22 = vpop.permute.xlu0 %1330 }
 0x380   : > { %v1347_v43 = vsel %vm432_vm0, %v870_v37, %v1331_v22 }
 0x381   : > { %1743 = vmatmul.mubr.msk.f32.gmra.mrb[10].mxu1 %vm1352_vm1, %v1347_v43 }
 0x43d   : > { %v1735_v47 = vpop.f32.mrb[8].mxu0 }
 0x43e   : > { %v1449_v15 = vadd.f32 %v1735_v47, %v1351_v16  ;;  %v1443_v58 = vpop.f32.mrb[9].mxu0 }
 0x43f   : > { %v1444_v52 = vadd.f32 %v1443_v58, %v1351_v16 }
 0x440   : > { %1483 = vst [vmem:[%s228_s9 + $0x8] sm:$0xff] %v1449_v15 }
 0x441   : > { %1482 = vst [vmem:[%s228_s9] sm:$0xff] %v1444_v52 }
 0x445   : > { %v1741_v39 = vpop.f32.mrb[8].mxu1 }
 0x446   : > { %v1469_v0 = vadd.f32 %v1741_v39, %v1351_v16  ;;  %v1463_v53 = vpop.f32.mrb[9].mxu1 }
 0x447   : > { %v1464_v27 = vadd.f32 %v1463_v53, %v1351_v16 }
 0x448   : > { %1487 = vst [vmem:[%s228_s9 + $0x28] sm:$0xff] %v1469_v0 }
 0x449   : > { %1486 = vst [vmem:[%s228_s9 + $0x20] sm:$0xff] %v1464_v27 }
 0x44c   : > { %v1738_v25 = vpop.f32.mrb[10].mxu0 }
 0x44d   : > { %v1459_v40 = vadd.f32 %v1738_v25, %v1351_v16  ;;  %v1453_v42 = vpop.f32.mrb[11].mxu0 }
 0x44e   : > { %v1454_v31 = vadd.f32 %v1453_v42, %v1351_v16 }
 0x44f   : > { %1485 = vst [vmem:[%s228_s9 + $0x18] sm:$0xff] %v1459_v40 }
 0x450   : > { %1484 = vst [vmem:[%s228_s9 + $0x10] sm:$0xff] %v1454_v31 }
 0x454   : > { %v1744_v12 = vpop.f32.mrb[10].mxu1 }
 0x455   : > { %v1479_v32 = vadd.f32 %v1744_v12, %v1351_v16  ;;  %v1473_v30 = vpop.f32.mrb[11].mxu1 }
 0x456   : > { %v1474_v62 = vadd.f32 %v1473_v30, %v1351_v16 }
 0x457   : > { %1489 = vst [vmem:[%s228_s9 + $0x38] sm:$0xff] %v1479_v32 }
 0x458   : > { %1488 = vst [vmem:[%s228_s9 + $0x30] sm:$0xff] %v1474_v62 }
 0x459   : > { %1929 = shalt.err (!%p1926_p5)
}
 0x45a   : > { %s1930_s29 = scalar_lea.hbm %s2778_s14, 1024  ;;  %s1934_s6 = scalar_lea.hbm %s2834_s4, 2048 }
 0x45b   : > { %p1931_p6 = scmp.ne.s32.totalorder %s2778_s14, %s1930_s29  ;;  %p1935_p10 = scmp.lt.u32.totalorder %s2778_s14, %s2834_s4 }
 0x45c   : > { %p1936_p11 = scmp.lt.u32.totalorder %s1934_s6, %s1930_s29  ;;  %p1938_p13 = scmp.lt.u32.totalorder %s1930_s29, %s2778_s14 }
 0x45d   : > { %p1932_p7 = pnand %p1931_p6, %p2067_p4 }
 0x45e   : > { %p1937_p12 = por %p1936_p11, %p1935_p10 }
 0x45f   : > { %p1933_p9 = pneg %p1932_p7 }
 0x460   : > { %p1939_p0 = por %p1938_p13, %p1937_p12 }
 0x462   : > { %p1940_p1 = pnand %p1939_p0, %p1933_p9 }
 0x464   : > { %1943 = shalt.err (!%p1940_p1)
}
 0x465   : > { %s2000_s9 = smov 128   ;;  %s2001_s10 = smov 8  }
 0x466   : > { %1785 = dma.vmem_to_hbm [thread:$0]  (%p2067_p4), %s2780_s11, 1024, %s2778_s14, %s2784_s21, %s2000_s9, %s2000_s9, %s2001_s10  }
 0x467 PF: > { %p1791_p2 = scmp.ge.s32.totalorder %s1994_s20, 2  ;;  %s1521_s12 = sand.u32 1, %s1974_s15  }
 0x468   : > { %s1522_s13 = scalar_lea.sflag [#allocation3], %s1521_s12 }
 0x469   : > { %p1788_p3 = pnand %p1791_p2, %p2074_p8 }
 0x46b   : > { %1969 = dma.done.wait (!%p1788_p3), %s1522_s13, 1024  }
 0x46c   : > { %1971 = vsyncadd (!%p1788_p3), %s1522_s13, 4294966272  ;;  %s17_s20 = sadd.s32 1, %s1994_s20   ;;  %s2837_s15 = smov %s1978_s16 }
 0x46d   : > { %p14_p5 = scmp.ge.s32.totalorder %s17_s20, 4   ;;  %s2838_s16 = smov %s1982_s17 }
 0x46e   : > { %s2839_s17 = smov %s2080_s28  ;;  %s2840_s18 = smov %s1990_s19 }
 0x46f   : > { %s2841_s19 = smov %s2843_s23  ;;  %16 = sbr.rel (!%p14_p5) target bundleno = 4 (0x4), region = 74 }
 0x476   :  { %1527 = vsyncpa [#allocation3], 1 }
 0x477   :  { %1529 = vsyncpa [#allocation3 + $0x1], 1 }

</bundles_post_ra>
